<compile_context>
chip_gen: v5e
topology: v5e:2x2
jax: 0.10.0
libtpu: 0.0.40
codegen_flags: <defaults>
</compile_context>

<pallas_src>
import functools
import math

import jax
import jax.numpy as jnp
from jax.experimental import pallas as pl
from jax.experimental.pallas import tpu as pltpu

_LOG2 = math.log(2.0)


def _shifted_softplus(x):
    return jax.nn.softplus(x) - _LOG2


def _tdt_kernel(xc_ref, xn_ref, r_ref, mask_ref,
                centers_ref,               # (1, G)       f32
                wfilt_ref,                 # (G, 2*Fp)    bf16  [filter-linear | filter-res-1]
                wmain_ref,                 # (Fp, 5*Fp)   bf16  [res-2 | Q | K | V | O]
                vecs_ref,                  # (16, Fp)     f32   rows: b_lin,b_res1,b_res2,bq,bk,bv,bo,ln_g,ln_b
                out_ref,
                q_sc, m_sc, l_sc, acc_sc,  # (TA, Fp) f32 scratch
                *, n_heads, head_dim, f_real, cutoff, gamma, post_ln, bf16_math):
    n = pl.program_id(2)
    n_last = pl.num_programs(2) - 1

    x_c = xc_ref[0]            # (TA, Fp)  center-atom features
    x_n = xn_ref[0]            # (TN, Fp)  neighbor-atom features (dense all-pairs)
    r = r_ref[0]               # (TA, TN)
    nbr_mask = mask_ref[0]     # (TA, TN)

    TA, TN = r.shape
    Fp = x_c.shape[-1]
    H, D = n_heads, head_dim
    neg_big = jnp.float32(-1e30)
    cdt = jnp.bfloat16 if bf16_math else jnp.float32

    # ---- init accumulators + (pre-scaled) query projection, once per (batch, atom-tile) ----
    @pl.when(n == 0)
    def _():
        wq = wmain_ref[:, Fp:2 * Fp]
        q = jnp.dot(x_c.astype(jnp.bfloat16), wq,
                    preferred_element_type=jnp.float32) + vecs_ref[3:4, :]
        q_sc[...] = q * jnp.float32(1.0 / (D ** 0.5))
        m_sc[...] = jnp.full_like(m_sc, neg_big)
        l_sc[...] = jnp.zeros_like(l_sc)
        acc_sc[...] = jnp.zeros_like(acc_sc)

    # ---- Gaussian smearing computed in-kernel (EUP; bf16 chain on v6e/v7x) ----
    c = centers_ref[...].astype(cdt).reshape(1, 1, -1)               # (1, 1, G)
    rb = r.astype(cdt)
    d = rb[:, :, None] - c
    f = jnp.exp((-gamma) * d * d)                                    # (TA, TN, G)
    G = f.shape[-1]
    f2 = f.reshape(TA * TN, G).astype(jnp.bfloat16)

    # ---- filter network: fused [linear | res-hidden] GEMM; splits are lane-tile aligned ----
    wf = jnp.dot(f2, wfilt_ref[...], preferred_element_type=jnp.float32)   # (TA*TN, 2Fp)
    w_lin = wf[:, :Fp] + vecs_ref[0:1, :]
    h = _shifted_softplus((wf[:, Fp:] + vecs_ref[1:2, :]).astype(cdt))
    w_res = jnp.dot(h.astype(jnp.bfloat16), wmain_ref[:, 0:Fp],
                    preferred_element_type=jnp.float32) + vecs_ref[2:3, :]
    W = (w_lin + w_res).reshape(TA, TN, Fp)

    # ---- cosine cutoff * neighbor mask ----
    cut = 0.5 * (jnp.cos(r * (jnp.pi / cutoff)) + 1.0)
    cut = jnp.where(r < cutoff, cut, 0.0) * nbr_mask
    W = W * cut[:, :, None]

    # ---- messages: neighbor features modulated by filter (broadcast, no xj copy) ----
    msg = x_n[None, :, :] * W                                        # (TA, TN, Fp)

    # ---- fused K/V projection (lane-aligned split of the 2*Fp output) ----
    msg2 = msg.reshape(TA * TN, Fp).astype(jnp.bfloat16)
    kv = jnp.dot(msg2, wmain_ref[:, 2 * Fp:4 * Fp],
                 preferred_element_type=jnp.float32)                 # (TA*TN, 2Fp)
    k = (kv[:, :Fp] + vecs_ref[4:5, :]).reshape(TA, TN, Fp)
    v = (kv[:, Fp:] + vecs_ref[5:6, :]).reshape(TA, TN, Fp)

    # ---- per-head scores WITHOUT MXU: masked full-lane reduces + broadcast back (f32) ----
    qk = q_sc[...][:, None, :] * k                                   # (TA, TN, Fp) f32
    lane = jax.lax.broadcasted_iota(jnp.int32, (1, 1, Fp), 2)
    s_exp = jnp.zeros((TA, TN, Fp), jnp.float32)
    for hh in range(H):
        hm = jnp.logical_and(lane >= hh * D, lane < (hh + 1) * D).astype(jnp.float32)
        s_h = jnp.sum(qk * hm, axis=-1, keepdims=True)               # (TA, TN, 1)
        s_exp = s_exp + s_h * hm                                     # head value repeated D times
    s_exp = jnp.where(nbr_mask[:, :, None] > 0.0, s_exp, neg_big)

    # ---- online (flash-style) softmax over the neighbor axis, stats head-expanded ----
    m_cur = jnp.max(s_exp, axis=1)                                   # (TA, Fp)
    m_new = jnp.maximum(m_sc[...], m_cur)
    alpha = jnp.exp(m_sc[...] - m_new)
    p = jnp.exp(s_exp - m_new[:, None, :]) * nbr_mask[:, :, None]    # (TA, TN, Fp)
    l_sc[...] = alpha * l_sc[...] + jnp.sum(p, axis=1)
    acc_sc[...] = alpha * acc_sc[...] + jnp.sum(p * v, axis=1)
    m_sc[...] = m_new

    # ---- finalize: normalize, output projection, residual, layer norm ----
    @pl.when(n == n_last)
    def _():
        inv_l = pl.reciprocal(l_sc[...] + 1e-9, approx=True)
        attn = acc_sc[...] * inv_l                                   # (TA, Fp)
        v_out = jnp.dot(attn.astype(jnp.bfloat16), wmain_ref[:, 4 * Fp:5 * Fp],
                        preferred_element_type=jnp.float32) + vecs_ref[6:7, :]
        # NOTE: fully-masked atoms get v_out = bo (output-projection bias leaks through),
        # matching the dense PyTorch reference behavior for padded atoms.
        y = x_c + v_out
        if post_ln:
            # padded lanes of y are exactly zero, so sums over Fp equal sums over the
            # real F channels; divide by the real channel count.
            inv_f = jnp.float32(1.0 / f_real)
            mu = jnp.sum(y, axis=-1, keepdims=True) * inv_f
            var = jnp.sum(y * y, axis=-1, keepdims=True) * inv_f - mu * mu
            var = jnp.maximum(var, 0.0)
            y = (y - mu) * jax.lax.rsqrt(var + 1e-5) * vecs_ref[7:8, :] + vecs_ref[8:9, :]
        out_ref[0] = y.astype(out_ref.dtype)


def init_params(key, n_atom_basis, n_gaussians):
    F, G = n_atom_basis, n_gaussians
    ks = jax.random.split(key, 8)
    s = 0.1
    return dict(
        wl_w=jax.random.normal(ks[0], (G, F), jnp.float32) * s,
        wl_b=jnp.zeros((1, F), jnp.float32),
        wr1_w=jax.random.normal(ks[1], (G, F), jnp.float32) * s,
        wr1_b=jnp.zeros((1, F), jnp.float32),
        wr2_w=jax.random.normal(ks[2], (F, F), jnp.float32) * s,
        wr2_b=jnp.zeros((1, F), jnp.float32),
        wq=jax.random.normal(ks[3], (F, F), jnp.float32) * s,
        bq=jnp.zeros((1, F), jnp.float32),
        wk=jax.random.normal(ks[4], (F, F), jnp.float32) * s,
        bk=jnp.zeros((1, F), jnp.float32),
        wv=jax.random.normal(ks[5], (F, F), jnp.float32) * s,
        bv=jnp.zeros((1, F), jnp.float32),
        wo=jax.random.normal(ks[6], (F, F), jnp.float32) * s,
        bo=jnp.zeros((1, F), jnp.float32),
        ln_g=jnp.ones((1, F), jnp.float32),
        ln_b=jnp.zeros((1, F), jnp.float32),
    )


def _round_up(n, m):
    return ((n + m - 1) // m) * m


def _device_defaults():
    """Generation-specific tiling / VMEM / math-precision defaults."""
    kind = ""
    try:
        kind = jax.devices()[0].device_kind.lower()
    except Exception:
        pass
    if "v7" in kind:   # 64 MiB VMEM, 2 TensorCores, bf16 VPU/EUP
        return dict(max_ta=64, max_tn=64, vmem_limit=48 * 2**20, bf16_math=True, two_cores=True)
    if "v6" in kind:   # 128 MiB VMEM, bf16 VPU/EUP
        return dict(max_ta=128, max_tn=128, vmem_limit=100 * 2**20, bf16_math=True, two_cores=False)
    if "v5" in kind:   # 128 MiB VMEM, no bf16 VPU/EUP -> keep transcendentals in f32
        return dict(max_ta=128, max_tn=128, vmem_limit=100 * 2**20, bf16_math=False, two_cores=False)
    return dict(max_ta=64, max_tn=128, vmem_limit=64 * 2**20, bf16_math=False, two_cores=False)


def _choose_tiles(NA, max_ta, max_tn, n_batch, two_cores):
    """Pick (padded extent P, atom tile TA, neighbor tile TN) with TA|P, TN|P."""
    if NA <= max_tn:
        TA = min(max_ta, _round_up(NA, 8))
        P = _round_up(NA, TA)
        TN = P                                  # single neighbor tile (full extent: legal block)
    else:
        step = math.lcm(max_ta, max_tn)
        P = _round_up(NA, step)
        TA, TN = max_ta, max_tn
    # v7x: make sure the "parallel" grid extent covers both TensorCores.
    while two_cores and n_batch * (P // TA) < 2 and TA >= 16 and TA % 16 == 0:
        TA //= 2
    return P, TA, TN


def tdt_interaction(x, r_ij, nbr_mask, params, *, centers,
                    n_heads=4, cutoff=8.0, gamma=0.5, post_ln=True,
                    max_ta=None, max_tn=None, vmem_limit_bytes=None, bf16_math=None):
    f32 = jnp.float32
    Nb, NA, F = x.shape
    NN = r_ij.shape[-1]
    G = int(centers.shape[-1])
    assert NN == NA, "dense all-pairs neighbor list assumed (N_nbh == N_a)"
    assert F % n_heads == 0, "n_atom_basis must be divisible by n_heads"
    H = n_heads
    D = F // H

    cfg = _device_defaults()
    max_ta = cfg["max_ta"] if max_ta is None else max_ta
    max_tn = cfg["max_tn"] if max_tn is None else max_tn
    vmem_limit_bytes = cfg["vmem_limit"] if vmem_limit_bytes is None else vmem_limit_bytes
    bf16_math = cfg["bf16_math"] if bf16_math is None else bf16_math

    # ---- pad feature dim to a lane multiple, atoms/neighbors to the tile grid ----
    Fp = _round_up(F, 128)
    P, TA, TN = _choose_tiles(NA, max_ta, max_tn, Nb, cfg["two_cores"])

    def pad2(w):   # (F,F) -> (Fp,Fp), zero rows & cols
        return jnp.pad(jnp.asarray(w, f32), ((0, Fp - F), (0, Fp - F)))

    def padc(w):   # (G,F) -> (G,Fp)
        return jnp.pad(jnp.asarray(w, f32), ((0, 0), (0, Fp - F)))

    def padv(b):   # (1,F) -> (Fp,)
        return jnp.pad(jnp.asarray(b, f32).reshape(-1), (0, Fp - F))

    # ---- pack parameters: 4 inputs instead of 15 (less pipeline bookkeeping / VMEM) ----
    wfilt = jnp.concatenate([padc(params["wl_w"]), padc(params["wr1_w"])],
                            axis=1).astype(jnp.bfloat16)                    # (G, 2Fp)
    wmain = jnp.concatenate([pad2(params["wr2_w"]), pad2(params["wq"]),
                             pad2(params["wk"]), pad2(params["wv"]),
                             pad2(params["wo"])], axis=1).astype(jnp.bfloat16)   # (Fp, 5Fp)
    rows = [padv(params["wl_b"]), padv(params["wr1_b"]), padv(params["wr2_b"]),
            padv(params["bq"]), padv(params["bk"]), padv(params["bv"]),
            padv(params["bo"]), padv(params["ln_g"]), padv(params["ln_b"])]
    while len(rows) < 16:
        rows.append(jnp.zeros((Fp,), f32))
    vecs = jnp.stack(rows)                                                  # (16, Fp)
    centers2 = jnp.asarray(centers, f32).reshape(1, G)

    # ---- pad data arrays (padded atoms masked out as neighbors; rows sliced off) ----
    xp = jnp.pad(jnp.asarray(x, f32), ((0, 0), (0, P - NA), (0, Fp - F)))
    rp = jnp.pad(jnp.asarray(r_ij, f32), ((0, 0), (0, P - NA), (0, P - NN)),
                 constant_values=float(cutoff))
    mp = jnp.pad(jnp.asarray(nbr_mask, f32), ((0, 0), (0, P - NA), (0, P - NN)))

    kernel = functools.partial(_tdt_kernel, n_heads=H, head_dim=D, f_real=F,
                               cutoff=float(cutoff), gamma=float(gamma),
                               post_ln=post_ln, bf16_math=bf16_math)

    data_specs = [
        pl.BlockSpec((1, TA, Fp), lambda b, a, n: (b, a, 0)),   # x (center atoms)
        pl.BlockSpec((1, TN, Fp), lambda b, a, n: (b, n, 0)),   # x (neighbor atoms)
        pl.BlockSpec((1, TA, TN), lambda b, a, n: (b, a, n)),   # r_ij
        pl.BlockSpec((1, TA, TN), lambda b, a, n: (b, a, n)),   # nbr_mask
    ]
    param_list = [centers2, wfilt, wmain, vecs]
    param_specs = [pl.BlockSpec(p.shape, lambda b, a, n, _nd=p.ndim: (0,) * _nd)
                   for p in param_list]

    # Advisory cost model for the XLA scheduler around the custom call.
    pairs = Nb * P * P
    flops = 2 * pairs * (G * 2 * Fp + Fp * Fp + Fp * 2 * Fp) + 4 * Nb * P * Fp * Fp
    transcendentals = pairs * (G + 3 * Fp)
    bytes_accessed = 4 * (xp.size + (P // TA) * xp.size + rp.size + mp.size + Nb * P * Fp)

    out = pl.pallas_call(
        kernel,
        out_shape=jax.ShapeDtypeStruct((Nb, P, Fp), jnp.float32),
        grid=(Nb, P // TA, P // TN),
        in_specs=data_specs + param_specs,
        out_specs=pl.BlockSpec((1, TA, Fp), lambda b, a, n: (b, a, 0)),
        scratch_shapes=[
            pltpu.VMEM((TA, Fp), jnp.float32),   # pre-scaled query projection
            pltpu.VMEM((TA, Fp), jnp.float32),   # running max (head-expanded)
            pltpu.VMEM((TA, Fp), jnp.float32),   # running denominator (head-expanded)
            pltpu.VMEM((TA, Fp), jnp.float32),   # running weighted-value accumulator
        ],
        compiler_params=pltpu.CompilerParams(
            dimension_semantics=("parallel", "parallel", "arbitrary"),
            vmem_limit_bytes=vmem_limit_bytes),
        cost_estimate=pl.CostEstimate(flops=flops, transcendentals=transcendentals,
                                      bytes_accessed=bytes_accessed),
    )(xp, xp, rp, mp, *param_list)
    return out[:, :NA, :F]


if __name__ == "__main__":
    # Small, deterministic example shapes.
    N_b, N_a, N_nbh = 2, 8, 8          # dense all-pairs neighbors: N_nbh == N_a
    n_atom_basis, n_gaussians, n_heads = 32, 16, 4
    cutoff = 8.0

    key = jax.random.PRNGKey(0)
    k_x, k_pos, k_p = jax.random.split(key, 3)

    x = jax.random.normal(k_x, (N_b, N_a, n_atom_basis), jnp.float32)

    # Synthetic geometry -> pairwise distances (Gaussian expansion happens in-kernel).
    pos = jax.random.uniform(k_pos, (N_b, N_a, 3), jnp.float32) * 5.0
    diff = pos[:, :, None, :] - pos[:, None, :, :]
    r_ij = jnp.sqrt(jnp.sum(diff * diff, axis=-1) + 1e-12)          # (N_b, N_a, N_nbh)

    centers = jnp.linspace(0.0, cutoff, n_gaussians, dtype=jnp.float32)

    # Mask out self-interaction (diagonal).
    eye = jnp.eye(N_a, dtype=jnp.float32)
    nbr_mask = jnp.broadcast_to(1.0 - eye, (N_b, N_a, N_nbh))

    params = init_params(k_p, n_atom_basis, n_gaussians)

    out = tdt_interaction(x, r_ij, nbr_mask, params, centers=centers,
                          n_heads=n_heads, cutoff=cutoff, gamma=0.5, post_ln=True)
    out = jax.block_until_ready(out)
    assert out.shape == (N_b, N_a, n_atom_basis)
    assert bool(jnp.all(jnp.isfinite(out)))
    print("KERNEL_OK")
</pallas_src>

<mosaic_0001>
module attributes {stable_mosaic.version = 11 : i64} {
  func.func @_tdt_kernel(%arg0: i32, %arg1: i32, %arg2: i32, %arg3: memref<1x8x128xf32, #tpu.memory_space<vmem>>, %arg4: memref<1x8x128xf32, #tpu.memory_space<vmem>>, %arg5: memref<1x8x8xf32, #tpu.memory_space<vmem>>, %arg6: memref<1x8x8xf32, #tpu.memory_space<vmem>>, %arg7: memref<1x16xf32, #tpu.memory_space<vmem>>, %arg8: memref<16x256xbf16, #tpu.memory_space<vmem>>, %arg9: memref<128x640xbf16, #tpu.memory_space<vmem>>, %arg10: memref<16x128xf32, #tpu.memory_space<vmem>>, %arg11: memref<1x8x128xf32, #tpu.memory_space<vmem>>, %arg12: memref<8x128xf32, #tpu.memory_space<vmem>>, %arg13: memref<8x128xf32, #tpu.memory_space<vmem>>, %arg14: memref<8x128xf32, #tpu.memory_space<vmem>>, %arg15: memref<8x128xf32, #tpu.memory_space<vmem>>) attributes {dimension_semantics = [#tpu.dimension_semantics<parallel>, #tpu.dimension_semantics<parallel>, #tpu.dimension_semantics<arbitrary>], iteration_bounds = array<i64: 2, 1, 1>, scalar_prefetch = 0 : i64, scratch_operands = 4 : i64, tpu.core_type = #tpu.core_type<tc>, window_params = [{transform_indices = @transform_0, window_bounds = array<i64: 1, 8, 128>}, {transform_indices = @transform_1, window_bounds = array<i64: 1, 8, 128>}, {transform_indices = @transform_2, window_bounds = array<i64: 1, 8, 8>}, {transform_indices = @transform_3, window_bounds = array<i64: 1, 8, 8>}, {pipeline_mode = #tpu.pipeline_mode<synchronous>, transform_indices = @transform_4, window_bounds = array<i64: 1, 16>}, {pipeline_mode = #tpu.pipeline_mode<synchronous>, transform_indices = @transform_5, window_bounds = array<i64: 16, 256>}, {pipeline_mode = #tpu.pipeline_mode<synchronous>, transform_indices = @transform_6, window_bounds = array<i64: 128, 640>}, {pipeline_mode = #tpu.pipeline_mode<synchronous>, transform_indices = @transform_7, window_bounds = array<i64: 16, 128>}, {transform_indices = @transform_8, window_bounds = array<i64: 1, 8, 128>}]} {
    %c0 = arith.constant 0 : index
    %c0_0 = arith.constant 0 : index
    %c0_1 = arith.constant 0 : index
    %0 = vector.load %arg3[%c0, %c0_0, %c0_1] : memref<1x8x128xf32, #tpu.memory_space<vmem>>, vector<1x8x128xf32>
    %1 = vector.shape_cast %0 : vector<1x8x128xf32> to vector<8x128xf32>
    %c0_2 = arith.constant 0 : index
    %c0_3 = arith.constant 0 : index
    %c0_4 = arith.constant 0 : index
    %2 = vector.load %arg4[%c0_2, %c0_3, %c0_4] : memref<1x8x128xf32, #tpu.memory_space<vmem>>, vector<1x8x128xf32>
    %3 = vector.shape_cast %2 : vector<1x8x128xf32> to vector<8x128xf32>
    %c0_5 = arith.constant 0 : index
    %c0_6 = arith.constant 0 : index
    %c0_7 = arith.constant 0 : index
    %4 = vector.load %arg5[%c0_5, %c0_6, %c0_7] : memref<1x8x8xf32, #tpu.memory_space<vmem>>, vector<1x8x8xf32>
    %5 = vector.shape_cast %4 : vector<1x8x8xf32> to vector<8x8xf32>
    %c0_8 = arith.constant 0 : index
    %c0_9 = arith.constant 0 : index
    %c0_10 = arith.constant 0 : index
    %6 = vector.load %arg6[%c0_8, %c0_9, %c0_10] : memref<1x8x8xf32, #tpu.memory_space<vmem>>, vector<1x8x8xf32>
    %7 = vector.shape_cast %6 : vector<1x8x8xf32> to vector<8x8xf32>
    %c0_i32 = arith.constant 0 : i32
    %8 = arith.cmpi eq, %arg2, %c0_i32 : i32
    %9 = arith.extui %8 : i1 to i32
    %cst = arith.constant -1.000000e+30 : f32
    %c0_i32_11 = arith.constant 0 : i32
    %10 = arith.cmpi ne, %9, %c0_i32_11 : i32
    scf.if %10 {
      %c0_69 = arith.constant 0 : index
      %c128 = arith.constant 128 : index
      %190 = vector.load %arg9[%c0_69, %c128] : memref<128x640xbf16, #tpu.memory_space<vmem>>, vector<128x128xbf16>
      %191 = arith.truncf %1 : vector<8x128xf32> to vector<8x128xbf16>
      %cst_70 = arith.constant dense<0.000000e+00> : vector<8x128xf32>
      %192 = tpu.matmul %191, %190, %cst_70 {dimension_numbers = #tpu.dot_dimension_numbers<[1], [0], [0], [1], [0, 0, 1, 1], [], []>} : vector<8x128xbf16>, vector<128x128xbf16>, vector<8x128xf32> -> vector<8x128xf32>
      %c3 = arith.constant 3 : index
      %c0_71 = arith.constant 0 : index
      %193 = vector.load %arg10[%c3, %c0_71] : memref<16x128xf32, #tpu.memory_space<vmem>>, vector<1x128xf32>
      %194 = vector.broadcast %193 : vector<1x128xf32> to vector<8x128xf32>
      %195 = arith.addf %192, %194 : vector<8x128xf32>
      %cst_72 = arith.constant 0.353553385 : f32
      %196 = vector.broadcast %cst_72 : f32 to vector<8x128xf32>
      %197 = arith.mulf %195, %196 : vector<8x128xf32>
      %c0_73 = arith.constant 0 : index
      %c0_74 = arith.constant 0 : index
      %198 = vector.load %arg12[%c0_73, %c0_74] : memref<8x128xf32, #tpu.memory_space<vmem>>, vector<8x128xf32>
      tpu.vector_store %arg12[%c0_73, %c0_74], %197 {strides = array<i32>} : memref<8x128xf32, #tpu.memory_space<vmem>>, vector<8x128xf32>,
      %199 = vector.broadcast %cst : f32 to vector<8x128xf32>
      %c0_75 = arith.constant 0 : index
      %c0_76 = arith.constant 0 : index
      %200 = vector.load %arg13[%c0_75, %c0_76] : memref<8x128xf32, #tpu.memory_space<vmem>>, vector<8x128xf32>
      tpu.vector_store %arg13[%c0_75, %c0_76], %199 {strides = array<i32>} : memref<8x128xf32, #tpu.memory_space<vmem>>, vector<8x128xf32>,
      %cst_77 = arith.constant 0.000000e+00 : f32
      %201 = vector.broadcast %cst_77 : f32 to vector<8x128xf32>
      %c0_78 = arith.constant 0 : index
      %c0_79 = arith.constant 0 : index
      %202 = vector.load %arg14[%c0_78, %c0_79] : memref<8x128xf32, #tpu.memory_space<vmem>>, vector<8x128xf32>
      tpu.vector_store %arg14[%c0_78, %c0_79], %201 {strides = array<i32>} : memref<8x128xf32, #tpu.memory_space<vmem>>, vector<8x128xf32>,
      %cst_80 = arith.constant 0.000000e+00 : f32
      %203 = vector.broadcast %cst_80 : f32 to vector<8x128xf32>
      %c0_81 = arith.constant 0 : index
      %c0_82 = arith.constant 0 : index
      %204 = vector.load %arg15[%c0_81, %c0_82] : memref<8x128xf32, #tpu.memory_space<vmem>>, vector<8x128xf32>
      tpu.vector_store %arg15[%c0_81, %c0_82], %203 {strides = array<i32>} : memref<8x128xf32, #tpu.memory_space<vmem>>, vector<8x128xf32>,
    } else {
    }
    %c0_12 = arith.constant 0 : index
    %c0_13 = arith.constant 0 : index
    %11 = vector.load %arg7[%c0_12, %c0_13] : memref<1x16xf32, #tpu.memory_space<vmem>>, vector<1x16xf32>
    %12 = vector.shape_cast %11 : vector<1x16xf32> to vector<1x1x16xf32>
    %13 = vector.shape_cast %5 : vector<8x8xf32> to vector<8x8x1xf32>
    %14 = vector.broadcast %13 : vector<8x8x1xf32> to vector<8x8x16xf32>
    %15 = vector.broadcast %12 : vector<1x1x16xf32> to vector<8x8x16xf32>
    %16 = arith.subf %14, %15 : vector<8x8x16xf32>
    %cst_14 = arith.constant -5.000000e-01 : f32
    %17 = vector.broadcast %cst_14 : f32 to vector<8x8x16xf32>
    %18 = arith.mulf %17, %16 : vector<8x8x16xf32>
    %19 = arith.mulf %18, %16 : vector<8x8x16xf32>
    %20 = math.exp %19 : vector<8x8x16xf32>
    %21 = vector.shape_cast %20 : vector<8x8x16xf32> to vector<64x16xf32>
    %22 = arith.truncf %21 : vector<64x16xf32> to vector<64x16xbf16>
    %c0_15 = arith.constant 0 : index
    %c0_16 = arith.constant 0 : index
    %23 = vector.load %arg8[%c0_15, %c0_16] : memref<16x256xbf16, #tpu.memory_space<vmem>>, vector<16x256xbf16>
    %cst_17 = arith.constant dense<0.000000e+00> : vector<64x256xf32>
    %24 = tpu.matmul %22, %23, %cst_17 {dimension_numbers = #tpu.dot_dimension_numbers<[1], [0], [0], [1], [0, 0, 1, 1], [], []>} : vector<64x16xbf16>, vector<16x256xbf16>, vector<64x256xf32> -> vector<64x256xf32>
    %25 = vector.extract_strided_slice %24 {offsets = [0, 0], sizes = [64, 128], strides = [1, 1]} : vector<64x256xf32> to vector<64x128xf32>
    %c0_18 = arith.constant 0 : index
    %c0_19 = arith.constant 0 : index
    %26 = vector.load %arg10[%c0_18, %c0_19] : memref<16x128xf32, #tpu.memory_space<vmem>>, vector<1x128xf32>
    %27 = vector.broadcast %26 : vector<1x128xf32> to vector<64x128xf32>
    %28 = arith.addf %25, %27 : vector<64x128xf32>
    %29 = vector.extract_strided_slice %24 {offsets = [0, 128], sizes = [64, 128], strides = [1, 1]} : vector<64x256xf32> to vector<64x128xf32>
    %c1 = arith.constant 1 : index
    %c0_20 = arith.constant 0 : index
    %30 = vector.load %arg10[%c1, %c0_20] : memref<16x128xf32, #tpu.memory_space<vmem>>, vector<1x128xf32>
    %31 = vector.broadcast %30 : vector<1x128xf32> to vector<64x128xf32>
    %32 = arith.addf %29, %31 : vector<64x128xf32>
    %cst_21 = arith.constant 0.000000e+00 : f32
    %33 = vector.broadcast %cst_21 : f32 to vector<64x128xf32>
    %34 = arith.maximumf %32, %33 : vector<64x128xf32>
    %35 = vector.broadcast %cst_21 : f32 to vector<64x128xf32>
    %36 = arith.subf %32, %35 : vector<64x128xf32>
    %37 = arith.cmpf one, %36, %36 : vector<64x128xf32>
    %38 = vector.broadcast %cst_21 : f32 to vector<64x128xf32>
    %39 = arith.addf %32, %38 : vector<64x128xf32>
    %40 = math.absf %36 : vector<64x128xf32>
    %cst_22 = arith.constant 0.000000e+00 : f32
    %41 = vector.broadcast %cst_22 : f32 to vector<64x128xf32>
    %42 = arith.subf %41, %40 : vector<64x128xf32>
    %43 = math.exp %42 : vector<64x128xf32>
    %44 = math.log1p %43 : vector<64x128xf32>
    %45 = arith.addf %34, %44 : vector<64x128xf32>
    %46 = arith.select %37, %39, %45 : vector<64x128xi1>, vector<64x128xf32>
    %cst_23 = arith.constant 0.693147182 : f32
    %47 = vector.broadcast %cst_23 : f32 to vector<64x128xf32>
    %48 = arith.subf %46, %47 : vector<64x128xf32>
    %49 = arith.truncf %48 : vector<64x128xf32> to vector<64x128xbf16>
    %c0_24 = arith.constant 0 : index
    %c0_25 = arith.constant 0 : index
    %50 = vector.load %arg9[%c0_24, %c0_25] : memref<128x640xbf16, #tpu.memory_space<vmem>>, vector<128x128xbf16>
    %cst_26 = arith.constant dense<0.000000e+00> : vector<64x128xf32>
    %51 = tpu.matmul %49, %50, %cst_26 {dimension_numbers = #tpu.dot_dimension_numbers<[1], [0], [0], [1], [0, 0, 1, 1], [], []>} : vector<64x128xbf16>, vector<128x128xbf16>, vector<64x128xf32> -> vector<64x128xf32>
    %c2 = arith.constant 2 : index
    %c0_27 = arith.constant 0 : index
    %52 = vector.load %arg10[%c2, %c0_27] : memref<16x128xf32, #tpu.memory_space<vmem>>, vector<1x128xf32>
    %53 = vector.broadcast %52 : vector<1x128xf32> to vector<64x128xf32>
    %54 = arith.addf %51, %53 : vector<64x128xf32>
    %55 = arith.addf %28, %54 : vector<64x128xf32>
    %56 = vector.shape_cast %55 : vector<64x128xf32> to vector<8x8x128xf32>
    %cst_28 = arith.constant 0.392699093 : f32
    %57 = vector.broadcast %cst_28 : f32 to vector<8x8xf32>
    %58 = arith.mulf %5, %57 : vector<8x8xf32>
    %59 = math.cos %58 : vector<8x8xf32>
    %cst_29 = arith.constant 1.000000e+00 : f32
    %60 = vector.broadcast %cst_29 : f32 to vector<8x8xf32>
    %61 = arith.addf %59, %60 : vector<8x8xf32>
    %cst_30 = arith.constant 5.000000e-01 : f32
    %62 = vector.broadcast %cst_30 : f32 to vector<8x8xf32>
    %63 = arith.mulf %62, %61 : vector<8x8xf32>
    %cst_31 = arith.constant 8.000000e+00 : f32
    %64 = vector.broadcast %cst_31 : f32 to vector<8x8xf32>
    %65 = arith.cmpf olt, %5, %64 : vector<8x8xf32>
    %cst_32 = arith.constant 0.000000e+00 : f32
    %66 = vector.broadcast %cst_32 : f32 to vector<8x8xf32>
    %67 = arith.select %65, %63, %66 : vector<8x8xi1>, vector<8x8xf32>
    %68 = arith.mulf %67, %7 : vector<8x8xf32>
    %69 = vector.shape_cast %68 : vector<8x8xf32> to vector<8x8x1xf32>
    %70 = vector.broadcast %69 : vector<8x8x1xf32> to vector<8x8x128xf32>
    %71 = arith.mulf %56, %70 : vector<8x8x128xf32>
    %72 = vector.shape_cast %3 : vector<8x128xf32> to vector<1x8x128xf32>
    %73 = vector.broadcast %72 : vector<1x8x128xf32> to vector<8x8x128xf32>
    %74 = arith.mulf %73, %71 : vector<8x8x128xf32>
    %75 = vector.shape_cast %74 : vector<8x8x128xf32> to vector<64x128xf32>
    %76 = arith.truncf %75 : vector<64x128xf32> to vector<64x128xbf16>
    %c0_33 = arith.constant 0 : index
    %c256 = arith.constant 256 : index
    %77 = vector.load %arg9[%c0_33, %c256] : memref<128x640xbf16, #tpu.memory_space<vmem>>, vector<128x256xbf16>
    %cst_34 = arith.constant dense<0.000000e+00> : vector<64x256xf32>
    %78 = tpu.matmul %76, %77, %cst_34 {dimension_numbers = #tpu.dot_dimension_numbers<[1], [0], [0], [1], [0, 0, 1, 1], [], []>} : vector<64x128xbf16>, vector<128x256xbf16>, vector<64x256xf32> -> vector<64x256xf32>
    %79 = vector.extract_strided_slice %78 {offsets = [0, 0], sizes = [64, 128], strides = [1, 1]} : vector<64x256xf32> to vector<64x128xf32>
    %c4 = arith.constant 4 : index
    %c0_35 = arith.constant 0 : index
    %80 = vector.load %arg10[%c4, %c0_35] : memref<16x128xf32, #tpu.memory_space<vmem>>, vector<1x128xf32>
    %81 = vector.broadcast %80 : vector<1x128xf32> to vector<64x128xf32>
    %82 = arith.addf %79, %81 : vector<64x128xf32>
    %83 = vector.shape_cast %82 : vector<64x128xf32> to vector<8x8x128xf32>
    %84 = vector.extract_strided_slice %78 {offsets = [0, 128], sizes = [64, 128], strides = [1, 1]} : vector<64x256xf32> to vector<64x128xf32>
    %c5 = arith.constant 5 : index
    %c0_36 = arith.constant 0 : index
    %85 = vector.load %arg10[%c5, %c0_36] : memref<16x128xf32, #tpu.memory_space<vmem>>, vector<1x128xf32>
    %86 = vector.broadcast %85 : vector<1x128xf32> to vector<64x128xf32>
    %87 = arith.addf %84, %86 : vector<64x128xf32>
    %88 = vector.shape_cast %87 : vector<64x128xf32> to vector<8x8x128xf32>
    %c0_37 = arith.constant 0 : index
    %c0_38 = arith.constant 0 : index
    %89 = vector.load %arg12[%c0_37, %c0_38] : memref<8x128xf32, #tpu.memory_space<vmem>>, vector<8x128xf32>
    %90 = vector.shape_cast %89 : vector<8x128xf32> to vector<8x1x128xf32>
    %91 = vector.broadcast %90 : vector<8x1x128xf32> to vector<8x8x128xf32>
    %92 = arith.mulf %91, %83 : vector<8x8x128xf32>
    %93 = tpu.iota {dimensions = array<i32: 2>} : vector<1x1x128xi32>
    %cst_39 = arith.constant 0.000000e+00 : f32
    %94 = vector.broadcast %cst_39 : f32 to vector<8x8x128xf32>
    %c0_i32_40 = arith.constant 0 : i32
    %95 = vector.broadcast %c0_i32_40 : i32 to vector<1x1x128xi32>
    %96 = arith.cmpi sge, %93, %95 : vector<1x1x128xi32>
    %c8_i32 = arith.constant 8 : i32
    %97 = vector.broadcast %c8_i32 : i32 to vector<1x1x128xi32>
    %98 = arith.cmpi slt, %93, %97 : vector<1x1x128xi32>
    %99 = arith.andi %96, %98 : vector<1x1x128xi1>
    %100 = arith.extui %99 : vector<1x1x128xi1> to vector<1x1x128xi32>
    %101 = arith.sitofp %100 : vector<1x1x128xi32> to vector<1x1x128xf32>
    %102 = vector.broadcast %101 : vector<1x1x128xf32> to vector<8x8x128xf32>
    %103 = arith.mulf %92, %102 : vector<8x8x128xf32>
    %cst_41 = arith.constant dense<0.000000e+00> : vector<8x8xf32>
    %104 = vector.multi_reduction <add>, %103, %cst_41 [2] : vector<8x8x128xf32> to vector<8x8xf32>
    %105 = vector.shape_cast %104 : vector<8x8xf32> to vector<8x8x1xf32>
    %106 = vector.broadcast %105 : vector<8x8x1xf32> to vector<8x8x128xf32>
    %107 = vector.broadcast %101 : vector<1x1x128xf32> to vector<8x8x128xf32>
    %108 = arith.mulf %106, %107 : vector<8x8x128xf32>
    %109 = arith.addf %94, %108 : vector<8x8x128xf32>
    %c8_i32_42 = arith.constant 8 : i32
    %110 = vector.broadcast %c8_i32_42 : i32 to vector<1x1x128xi32>
    %111 = arith.cmpi sge, %93, %110 : vector<1x1x128xi32>
    %c16_i32 = arith.constant 16 : i32
    %112 = vector.broadcast %c16_i32 : i32 to vector<1x1x128xi32>
    %113 = arith.cmpi slt, %93, %112 : vector<1x1x128xi32>
    %114 = arith.andi %111, %113 : vector<1x1x128xi1>
    %115 = arith.extui %114 : vector<1x1x128xi1> to vector<1x1x128xi32>
    %116 = arith.sitofp %115 : vector<1x1x128xi32> to vector<1x1x128xf32>
    %117 = vector.broadcast %116 : vector<1x1x128xf32> to vector<8x8x128xf32>
    %118 = arith.mulf %92, %117 : vector<8x8x128xf32>
    %cst_43 = arith.constant dense<0.000000e+00> : vector<8x8xf32>
    %119 = vector.multi_reduction <add>, %118, %cst_43 [2] : vector<8x8x128xf32> to vector<8x8xf32>
    %120 = vector.shape_cast %119 : vector<8x8xf32> to vector<8x8x1xf32>
    %121 = vector.broadcast %120 : vector<8x8x1xf32> to vector<8x8x128xf32>
    %122 = vector.broadcast %116 : vector<1x1x128xf32> to vector<8x8x128xf32>
    %123 = arith.mulf %121, %122 : vector<8x8x128xf32>
    %124 = arith.addf %109, %123 : vector<8x8x128xf32>
    %c16_i32_44 = arith.constant 16 : i32
    %125 = vector.broadcast %c16_i32_44 : i32 to vector<1x1x128xi32>
    %126 = arith.cmpi sge, %93, %125 : vector<1x1x128xi32>
    %c24_i32 = arith.constant 24 : i32
    %127 = vector.broadcast %c24_i32 : i32 to vector<1x1x128xi32>
    %128 = arith.cmpi slt, %93, %127 : vector<1x1x128xi32>
    %129 = arith.andi %126, %128 : vector<1x1x128xi1>
    %130 = arith.extui %129 : vector<1x1x128xi1> to vector<1x1x128xi32>
    %131 = arith.sitofp %130 : vector<1x1x128xi32> to vector<1x1x128xf32>
    %132 = vector.broadcast %131 : vector<1x1x128xf32> to vector<8x8x128xf32>
    %133 = arith.mulf %92, %132 : vector<8x8x128xf32>
    %cst_45 = arith.constant dense<0.000000e+00> : vector<8x8xf32>
    %134 = vector.multi_reduction <add>, %133, %cst_45 [2] : vector<8x8x128xf32> to vector<8x8xf32>
    %135 = vector.shape_cast %134 : vector<8x8xf32> to vector<8x8x1xf32>
    %136 = vector.broadcast %135 : vector<8x8x1xf32> to vector<8x8x128xf32>
    %137 = vector.broadcast %131 : vector<1x1x128xf32> to vector<8x8x128xf32>
    %138 = arith.mulf %136, %137 : vector<8x8x128xf32>
    %139 = arith.addf %124, %138 : vector<8x8x128xf32>
    %c24_i32_46 = arith.constant 24 : i32
    %140 = vector.broadcast %c24_i32_46 : i32 to vector<1x1x128xi32>
    %141 = arith.cmpi sge, %93, %140 : vector<1x1x128xi32>
    %c32_i32 = arith.constant 32 : i32
    %142 = vector.broadcast %c32_i32 : i32 to vector<1x1x128xi32>
    %143 = arith.cmpi slt, %93, %142 : vector<1x1x128xi32>
    %144 = arith.andi %141, %143 : vector<1x1x128xi1>
    %145 = arith.extui %144 : vector<1x1x128xi1> to vector<1x1x128xi32>
    %146 = arith.sitofp %145 : vector<1x1x128xi32> to vector<1x1x128xf32>
    %147 = vector.broadcast %146 : vector<1x1x128xf32> to vector<8x8x128xf32>
    %148 = arith.mulf %92, %147 : vector<8x8x128xf32>
    %cst_47 = arith.constant dense<0.000000e+00> : vector<8x8xf32>
    %149 = vector.multi_reduction <add>, %148, %cst_47 [2] : vector<8x8x128xf32> to vector<8x8xf32>
    %150 = vector.shape_cast %149 : vector<8x8xf32> to vector<8x8x1xf32>
    %151 = vector.broadcast %150 : vector<8x8x1xf32> to vector<8x8x128xf32>
    %152 = vector.broadcast %146 : vector<1x1x128xf32> to vector<8x8x128xf32>
    %153 = arith.mulf %151, %152 : vector<8x8x128xf32>
    %154 = arith.addf %139, %153 : vector<8x8x128xf32>
    %155 = vector.shape_cast %7 : vector<8x8xf32> to vector<8x8x1xf32>
    %cst_48 = arith.constant 0.000000e+00 : f32
    %156 = vector.broadcast %cst_48 : f32 to vector<8x8x1xf32>
    %157 = arith.cmpf ogt, %155, %156 : vector<8x8x1xf32>
    %cst_49 = arith.constant -1.000000e+30 : f32
    %158 = vector.shape_cast %157 : vector<8x8x1xi1> to vector<8x8x1xi1>
    %159 = vector.broadcast %158 : vector<8x8x1xi1> to vector<8x8x128xi1>
    %160 = vector.broadcast %cst_49 : f32 to vector<8x8x128xf32>
    %161 = arith.select %159, %154, %160 : vector<8x8x128xi1>, vector<8x8x128xf32>
    %cst_50 = arith.constant dense<0xFF800000> : vector<8x128xf32>
    %162 = vector.multi_reduction <maximumf>, %161, %cst_50 [1] : vector<8x8x128xf32> to vector<8x128xf32>
    %c0_51 = arith.constant 0 : index
    %c0_52 = arith.constant 0 : index
    %163 = vector.load %arg13[%c0_51, %c0_52] : memref<8x128xf32, #tpu.memory_space<vmem>>, vector<8x128xf32>
    %164 = arith.maximumf %163, %162 : vector<8x128xf32>
    %c0_53 = arith.constant 0 : index
    %c0_54 = arith.constant 0 : index
    %165 = vector.load %arg13[%c0_53, %c0_54] : memref<8x128xf32, #tpu.memory_space<vmem>>, vector<8x128xf32>
    %166 = arith.subf %165, %164 : vector<8x128xf32>
    %167 = math.exp %166 : vector<8x128xf32>
    %168 = vector.shape_cast %164 : vector<8x128xf32> to vector<8x1x128xf32>
    %169 = vector.broadcast %168 : vector<8x1x128xf32> to vector<8x8x128xf32>
    %170 = arith.subf %161, %169 : vector<8x8x128xf32>
    %171 = math.exp %170 : vector<8x8x128xf32>
    %172 = vector.shape_cast %7 : vector<8x8xf32> to vector<8x8x1xf32>
    %173 = vector.broadcast %172 : vector<8x8x1xf32> to vector<8x8x128xf32>
    %174 = arith.mulf %171, %173 : vector<8x8x128xf32>
    %c0_55 = arith.constant 0 : index
    %c0_56 = arith.constant 0 : index
    %175 = vector.load %arg14[%c0_55, %c0_56] : memref<8x128xf32, #tpu.memory_space<vmem>>, vector<8x128xf32>
    %176 = arith.mulf %167, %175 : vector<8x128xf32>
    %cst_57 = arith.constant dense<0.000000e+00> : vector<8x128xf32>
    %177 = vector.multi_reduction <add>, %174, %cst_57 [1] : vector<8x8x128xf32> to vector<8x128xf32>
    %178 = arith.addf %176, %177 : vector<8x128xf32>
    %c0_58 = arith.constant 0 : index
    %c0_59 = arith.constant 0 : index
    %179 = vector.load %arg14[%c0_58, %c0_59] : memref<8x128xf32, #tpu.memory_space<vmem>>, vector<8x128xf32>
    tpu.vector_store %arg14[%c0_58, %c0_59], %178 {strides = array<i32>} : memref<8x128xf32, #tpu.memory_space<vmem>>, vector<8x128xf32>,
    %c0_60 = arith.constant 0 : index
    %c0_61 = arith.constant 0 : index
    %180 = vector.load %arg15[%c0_60, %c0_61] : memref<8x128xf32, #tpu.memory_space<vmem>>, vector<8x128xf32>
    %181 = arith.mulf %167, %180 : vector<8x128xf32>
    %182 = arith.mulf %174, %88 : vector<8x8x128xf32>
    %cst_62 = arith.constant dense<0.000000e+00> : vector<8x128xf32>
    %183 = vector.multi_reduction <add>, %182, %cst_62 [1] : vector<8x8x128xf32> to vector<8x128xf32>
    %184 = arith.addf %181, %183 : vector<8x128xf32>
    %c0_63 = arith.constant 0 : index
    %c0_64 = arith.constant 0 : index
    %185 = vector.load %arg15[%c0_63, %c0_64] : memref<8x128xf32, #tpu.memory_space<vmem>>, vector<8x128xf32>
    tpu.vector_store %arg15[%c0_63, %c0_64], %184 {strides = array<i32>} : memref<8x128xf32, #tpu.memory_space<vmem>>, vector<8x128xf32>,
    %c0_65 = arith.constant 0 : index
    %c0_66 = arith.constant 0 : index
    %186 = vector.load %arg13[%c0_65, %c0_66] : memref<8x128xf32, #tpu.memory_space<vmem>>, vector<8x128xf32>
    tpu.vector_store %arg13[%c0_65, %c0_66], %164 {strides = array<i32>} : memref<8x128xf32, #tpu.memory_space<vmem>>, vector<8x128xf32>,
    %c0_i32_67 = arith.constant 0 : i32
    %187 = arith.cmpi eq, %arg2, %c0_i32_67 : i32
    %188 = arith.extui %187 : i1 to i32
    %c0_i32_68 = arith.constant 0 : i32
    %189 = arith.cmpi ne, %188, %c0_i32_68 : i32
    scf.if %189 {
      %c0_69 = arith.constant 0 : index
      %c0_70 = arith.constant 0 : index
      %190 = vector.load %arg14[%c0_69, %c0_70] : memref<8x128xf32, #tpu.memory_space<vmem>>, vector<8x128xf32>
      %cst_71 = arith.constant 9.99999971E-10 : f32
      %191 = vector.broadcast %cst_71 : f32 to vector<8x128xf32>
      %192 = arith.addf %190, %191 : vector<8x128xf32>
      %193 = tpu.reciprocal %192 {approx = true} : vector<8x128xf32> -> vector<8x128xf32>
      %c0_72 = arith.constant 0 : index
      %c0_73 = arith.constant 0 : index
      %194 = vector.load %arg15[%c0_72, %c0_73] : memref<8x128xf32, #tpu.memory_space<vmem>>, vector<8x128xf32>
      %195 = arith.mulf %194, %193 : vector<8x128xf32>
      %196 = arith.truncf %195 : vector<8x128xf32> to vector<8x128xbf16>
      %c0_74 = arith.constant 0 : index
      %c512 = arith.constant 512 : index
      %197 = vector.load %arg9[%c0_74, %c512] : memref<128x640xbf16, #tpu.memory_space<vmem>>, vector<128x128xbf16>
      %cst_75 = arith.constant dense<0.000000e+00> : vector<8x128xf32>
      %198 = tpu.matmul %196, %197, %cst_75 {dimension_numbers = #tpu.dot_dimension_numbers<[1], [0], [0], [1], [0, 0, 1, 1], [], []>} : vector<8x128xbf16>, vector<128x128xbf16>, vector<8x128xf32> -> vector<8x128xf32>
      %c6 = arith.constant 6 : index
      %c0_76 = arith.constant 0 : index
      %199 = vector.load %arg10[%c6, %c0_76] : memref<16x128xf32, #tpu.memory_space<vmem>>, vector<1x128xf32>
      %200 = vector.broadcast %199 : vector<1x128xf32> to vector<8x128xf32>
      %201 = arith.addf %198, %200 : vector<8x128xf32>
      %202 = arith.addf %1, %201 : vector<8x128xf32>
      %cst_77 = arith.constant dense<0.000000e+00> : vector<8xf32>
      %203 = vector.multi_reduction <add>, %202, %cst_77 [1] : vector<8x128xf32> to vector<8xf32>
      %204 = vector.shape_cast %203 : vector<8xf32> to vector<8x1xf32>
      %cst_78 = arith.constant 3.125000e-02 : f32
      %205 = vector.broadcast %cst_78 : f32 to vector<8x1xf32>
      %206 = arith.mulf %204, %205 : vector<8x1xf32>
      %207 = arith.mulf %202, %202 : vector<8x128xf32>
      %cst_79 = arith.constant dense<0.000000e+00> : vector<8xf32>
      %208 = vector.multi_reduction <add>, %207, %cst_79 [1] : vector<8x128xf32> to vector<8xf32>
      %209 = vector.shape_cast %208 : vector<8xf32> to vector<8x1xf32>
      %cst_80 = arith.constant 3.125000e-02 : f32
      %210 = vector.broadcast %cst_80 : f32 to vector<8x1xf32>
      %211 = arith.mulf %209, %210 : vector<8x1xf32>
      %212 = arith.mulf %206, %206 : vector<8x1xf32>
      %213 = arith.subf %211, %212 : vector<8x1xf32>
      %cst_81 = arith.constant 0.000000e+00 : f32
      %214 = vector.broadcast %cst_81 : f32 to vector<8x1xf32>
      %215 = arith.maximumf %213, %214 : vector<8x1xf32>
      %216 = vector.broadcast %206 : vector<8x1xf32> to vector<8x128xf32>
      %217 = arith.subf %202, %216 : vector<8x128xf32>
      %cst_82 = arith.constant 9.99999974E-6 : f32
      %218 = vector.broadcast %cst_82 : f32 to vector<8x1xf32>
      %219 = arith.addf %215, %218 : vector<8x1xf32>
      %220 = math.rsqrt %219 : vector<8x1xf32>
      %221 = vector.broadcast %220 : vector<8x1xf32> to vector<8x128xf32>
      %222 = arith.mulf %217, %221 : vector<8x128xf32>
      %c7 = arith.constant 7 : index
      %c0_83 = arith.constant 0 : index
      %223 = vector.load %arg10[%c7, %c0_83] : memref<16x128xf32, #tpu.memory_space<vmem>>, vector<1x128xf32>
      %224 = vector.broadcast %223 : vector<1x128xf32> to vector<8x128xf32>
      %225 = arith.mulf %222, %224 : vector<8x128xf32>
      %c8 = arith.constant 8 : index
      %c0_84 = arith.constant 0 : index
      %226 = vector.load %arg10[%c8, %c0_84] : memref<16x128xf32, #tpu.memory_space<vmem>>, vector<1x128xf32>
      %227 = vector.broadcast %226 : vector<1x128xf32> to vector<8x128xf32>
      %228 = arith.addf %225, %227 : vector<8x128xf32>
      %c0_85 = arith.constant 0 : index
      %c0_86 = arith.constant 0 : index
      %c0_87 = arith.constant 0 : index
      %229 = vector.load %arg11[%c0_85, %c0_86, %c0_87] : memref<1x8x128xf32, #tpu.memory_space<vmem>>, vector<1x8x128xf32>
      %230 = vector.shape_cast %229 : vector<1x8x128xf32> to vector<8x128xf32>
      %231 = vector.shape_cast %228 : vector<8x128xf32> to vector<1x8x128xf32>
      tpu.vector_store %arg11[%c0_85, %c0_86, %c0_87], %231 {strides = array<i32>} : memref<1x8x128xf32, #tpu.memory_space<vmem>>, vector<1x8x128xf32>,
    } else {
    }
    return
  }
  func.func @transform_0(%arg0: i32, %arg1: i32, %arg2: i32) -> (i32, i32, i32) {
    %c0_i32 = arith.constant 0 : i32
    %c0_i32_0 = arith.constant 0 : i32
    return %arg0, %arg1, %c0_i32 : i32, i32, i32
  }
  func.func @transform_1(%arg0: i32, %arg1: i32, %arg2: i32) -> (i32, i32, i32) {
    %c0_i32 = arith.constant 0 : i32
    %c0_i32_0 = arith.constant 0 : i32
    return %arg0, %arg2, %c0_i32 : i32, i32, i32
  }
  func.func @transform_2(%arg0: i32, %arg1: i32, %arg2: i32) -> (i32, i32, i32) {
    %c0_i32 = arith.constant 0 : i32
    return %arg0, %arg1, %arg2 : i32, i32, i32
  }
  func.func @transform_3(%arg0: i32, %arg1: i32, %arg2: i32) -> (i32, i32, i32) {
    %c0_i32 = arith.constant 0 : i32
    return %arg0, %arg1, %arg2 : i32, i32, i32
  }
  func.func @transform_4(%arg0: i32, %arg1: i32, %arg2: i32) -> (i32, i32) {
    %c0_i32 = arith.constant 0 : i32
    %c0_i32_0 = arith.constant 0 : i32
    %c0_i32_1 = arith.constant 0 : i32
    return %c0_i32, %c0_i32_0 : i32, i32
  }
  func.func @transform_5(%arg0: i32, %arg1: i32, %arg2: i32) -> (i32, i32) {
    %c0_i32 = arith.constant 0 : i32
    %c0_i32_0 = arith.constant 0 : i32
    %c0_i32_1 = arith.constant 0 : i32
    return %c0_i32, %c0_i32_0 : i32, i32
  }
  func.func @transform_6(%arg0: i32, %arg1: i32, %arg2: i32) -> (i32, i32) {
    %c0_i32 = arith.constant 0 : i32
    %c0_i32_0 = arith.constant 0 : i32
    %c0_i32_1 = arith.constant 0 : i32
    return %c0_i32, %c0_i32_0 : i32, i32
  }
  func.func @transform_7(%arg0: i32, %arg1: i32, %arg2: i32) -> (i32, i32) {
    %c0_i32 = arith.constant 0 : i32
    %c0_i32_0 = arith.constant 0 : i32
    %c0_i32_1 = arith.constant 0 : i32
    return %c0_i32, %c0_i32_0 : i32, i32
  }
  func.func @transform_8(%arg0: i32, %arg1: i32, %arg2: i32) -> (i32, i32, i32) {
    %c0_i32 = arith.constant 0 : i32
    %c0_i32_0 = arith.constant 0 : i32
    return %arg0, %arg1, %c0_i32 : i32, i32, i32
  }
}

</mosaic_0001>

<bundles_post_ra>
// kernel: tpu_custom_call.1
= control target key start
LH: loop header
LB: loop body
LE: loop exit
PB: predicated region body
PF: predicated region fallthrough
CT: control target
= control target key end

     0   :  { %s3891_s0 = inlined_call_operand.hbm [shape: f32[2,8,128], index: 0, kind: input, shape index: {}]   ;;  %s3892_s1 = inlined_call_operand.hbm [shape: f32[2,8,128], index: 1, kind: input, shape index: {}]   ;;  %s3893_s2 = inlined_call_operand.hbm [shape: f32[2,8,8], index: 2, kind: input, shape index: {}]   ;;  %s3894_s3 = inlined_call_operand.hbm [shape: f32[2,8,8], index: 3, kind: input, shape index: {}]   ;;  %s3895_s4 = inlined_call_operand.vmem [shape: f32[1,16], index: 4, kind: input, shape index: {}]   ;;  %s3896_s5 = inlined_call_operand.hbm [shape: bf16[16,256], index: 5, kind: input, shape index: {}]   ;;  %s3897_s6 = inlined_call_operand.hbm [shape: bf16[128,640], index: 6, kind: input, shape index: {}]   ;;  %s3898_s7 = inlined_call_operand.hbm [shape: f32[16,128], index: 7, kind: input, shape index: {}]   ;;  %s3899_s8 = inlined_call_operand.hbm [shape: f32[2,8,128], index: 8, kind: output, shape index: {}]  }
   0x1   :  { %3907 = sst [smem:[#allocation30_spill]] %s3891_s0 }
   0x2   :  { %3908 = sst [smem:[#allocation31_spill]] %s3892_s1 }
   0x3   :  { %3909 = sst [smem:[#allocation32_spill]] %s3896_s5 }
   0x4   :  { %3910 = sst [smem:[#allocation33_spill]] %s3897_s6 }
   0x5   :  { %3911 = sst [smem:[#allocation34_spill]] %s3898_s7 }
   0x6   :  { %13 = vsyncpa [#allocation7], 0 }
   0x7   :  { %15 = vsyncpa [#allocation7 + $0x1], 0 }
   0x8   :  { %16 = vsyncpa [#allocation10], 0 }
   0x9   :  { %18 = vsyncpa [#allocation10 + $0x1], 0 }
   0xa   :  { %19 = vsyncpa [#allocation13], 0 }
   0xb   :  { %21 = vsyncpa [#allocation13 + $0x1], 0 }
   0xc   :  { %22 = vsyncpa [#allocation16], 0 }
   0xd   :  { %23 = vsyncpa [#allocation8], 0 }
   0xe   :  { %25 = vsyncpa [#allocation8 + $0x1], 0  ;;  %s3238_s27 = smov 0   ;;  %s3240_s28 = smov 0  }
   0xf   :  { %s3242_s29 = smov 0   ;;  %s3244_s30 = smov 0  }
  0x10   :  { %s3246_s9 = smov 0   ;;  %s3248_s10 = smov 0  }
  0x11 LB: > { %3912 = sst [smem:[#allocation25_spill]] %s3164_s29  ;;  %s3269_s11 = sadd.s32 4294967295, %s3176_s10   ;;  %s3176_s10 = sphi %s3248_s10, %s31_s10   ;;  %s3172_s9 = sphi %s3246_s9, %s3938_s9   ;;  %s3168_s30 = sphi %s3244_s30, %s3937_s30   ;;  %s3164_s29 = sphi %s3242_s29, %s3936_s29   ;;  %s3160_s28 = sphi %s3240_s28, %s3940_s28   ;;  %s3156_s27 = sphi %s3238_s27, %s3939_s27  }
  0x12   : > { %3913 = sst [smem:[#allocation26_spill]] %s3172_s9  ;;  %s2394_s12 = sadd.s32 4294967294, %s3176_s10  }
  0x13   : > { %p72_p0 = scmp.ne.s32.totalorder %s3160_s28, %s3156_s27  ;;  %p73_p1 = scmp.eq.s32.totalorder %s3269_s11, 0 }
  0x14   : > { %p270_p2 = scmp.eq.s32.totalorder %s3269_s11, 1  ;;  %p276_p3 = scmp.eq.s32.totalorder %s2394_s12, 1 }
  0x15   : > { %p3278_p4 = por %p73_p1, %p72_p0  ;;  %p2395_p5 = scmp.ge.s32.totalorder %s3176_s10, 1 }
  0x16   : > { %p3283_p6 = por %p276_p3, %p72_p0  ;;  %p283_p7 = scmp.lt.s32.totalorder %s3176_s10, 3 }
  0x17   : > { %s3917_s5 = sld [smem:[#allocation32_spill]]  ;;  %s3178_s19 = smov [#allocation14]  }
  0x18   : > { %s3915_s14 = scalar_select %p3283_p6, 1, 0 }
  0x19   : > { %p3291_p8 = pnand %p2395_p5, %p283_p7  ;;  %s299_s20 = sshll.u32 %s3178_s19, 4  ;;  %s300_s20 = int_to_ptr.vmem [resolvable:$true] %s299_s20 }
  0x1a   : > { %3916 = sst [smem:[#allocation27_spill]] %s3915_s14  ;;  %s3900_s25 = smov 128  }
  0x1b   : > { %p2685_p9 = pneg %p3291_p8  ;;  %s3920_s6 = sld [smem:[#allocation33_spill]] }
  0x1c   : > { %s3901_s26 = smov 8   ;;  %s3181_s12 = smov [#allocation15]  }
  0x1d   : > { %s297_s17 = sshll.u32 %s3917_s5, 4  ;;  %p3299_p10 = pnand %p2685_p9, %p73_p1  ;;  %s298_s17 = int_to_ptr.hbm [resolvable:$true] %s297_s17 }
  0x1e   : > { %s313_s15 = sshll.u32 %s3181_s12, 4  ;;  %s3182_s16 = smov 320   ;;  %s314_s15 = int_to_ptr.vmem [resolvable:$true] %s313_s15 }
  0x1f   : > { %2688 = dma.hbm_to_vmem [thread:$0]  (!%p3299_p10), %s298_s17, 256, %s300_s20, [#allocation13], %s3900_s25, %s3900_s25, %s3901_s26  }
  0x20   : > { %s3183_s19 = smov 20   ;;  %s50_s22 = sadd.s32 1, %s3172_s9 }
  0x21   : > { %s311_s24 = sshll.u32 %s3920_s6, 4  ;;  %s59_s23 = sadd.s32 1, %s3164_s29  ;;  %s312_s24 = int_to_ptr.hbm [resolvable:$true] %s311_s24 }
  0x22   : > { %2691 = dma.hbm_to_vmem [thread:$0]  (!%p3299_p10), %s312_s24, 5120, %s314_s15, [#allocation16], %s3182_s16, %s3182_s16, %s3183_s19  }
  0x23   : > { %p52_p12 = scmp.ge.s32.totalorder %s50_s22, 2  ;;  %p66_p13 = scmp.ne.s32.totalorder %s3164_s29, %s3160_s28 }
  0x24   : > { %p67_p0 = scmp.eq.s32.totalorder %s3176_s10, 0  ;;  %p2715_p3 = scmp.lt.s32.totalorder %s3176_s10, 2 }
  0x25   : > { %s3942_s22 = smov (%p52_p12, %s50_s22), 0  ;;  %p3324_p7 = por %p270_p2, %p66_p13 }
  0x26   : > { %3921 = sst [smem:[#allocation28_spill]] %s3942_s22  ;;  %p68_p5 = por %p67_p0, %p66_p13 }
  0x27   : > { %s54_s20 = ssub.s32 %s3172_s9, %s3942_s22  ;;  %s341_s24 = sand.u32 1, %s3164_s29  }
  0x28   : > { %p57_p9 = scmp.eq.s32.totalorder %s54_s20, 0  ;;  %s3331_s12 = sshll.u32 %s341_s24, 3 }
  0x29   : > { %s3334_s15 = sshll.u32 %s3172_s9, 3  ;;  %p3336_p11 = pnand %p2715_p3, %p68_p5 }
  0x2a   : > { %s3341_s19 = scalar_select %p57_p9, %s3164_s29, %s59_s23  }
  0x2b   : > { %s3906_s25 = sand.u32 1, %s3176_s10   ;;  %s3925_s1 = sld [smem:[#allocation31_spill]] }
  0x2c   : > { %3924 = sst [smem:[#allocation29_spill]] %s3341_s19  ;;  %s365_s6 = scalar_lea.vmem [#allocation9], %s3331_s12 }
  0x2d   : > { %s374_s22 = sshll.u32 %s365_s6, 4  ;;  %s362_s14 = scalar_lea.sflag [#allocation10], %s3906_s25  ;;  %s375_s22 = int_to_ptr.vmem [resolvable:$true] %s374_s22 }
  0x2e   : > { %s3926_s7 = sld [smem:[#allocation34_spill]]  ;;  %s3184_s5 = smov [#allocation17]  }
  0x2f   : > { %s327_s26 = sshll.u32 %s3184_s5, 4  ;;  %s3927_s6 = smov 8   ;;  %s328_s26 = int_to_ptr.vmem [resolvable:$true] %s327_s26 }
  0x30   : > { %s3929_s0 = sld [smem:[#allocation30_spill]]  ;;  %s345_s19 = scalar_lea.vmem [#allocation6], %s3331_s12 }
  0x31   : > { %s370_s20 = scalar_lea.hbm %s3925_s1, %s3334_s15  ;;  %s354_s23 = sshll.u32 %s345_s19, 4  ;;  %s355_s23 = int_to_ptr.vmem [resolvable:$true] %s354_s23 }
  0x32   : > { %s372_s9 = sshll.u32 %s370_s20, 4  ;;  %s3928_s20 = smov 128   ;;  %s373_s9 = int_to_ptr.hbm [resolvable:$true] %s372_s9 }
  0x33   : > { %2701 = dma.hbm_to_vmem [thread:$0]  (!%p3336_p11), %s373_s9, 128, %s375_s22, %s362_s14  }
  0x34   : > { %s325_s29 = sshll.u32 %s3926_s7, 4  ;;  %s342_s5 = scalar_lea.sflag [#allocation7], %s341_s24  ;;  %s326_s29 = int_to_ptr.hbm [resolvable:$true] %s325_s29 }
  0x35   : > { %2694 = dma.hbm_to_vmem [thread:$0]  (!%p3299_p10), %s326_s29, 256, %s328_s26, [#allocation16], %s3928_s20, %s3928_s20, %s3927_s6  }
  0x36   : > { %s350_s9 = scalar_lea.hbm %s3929_s0, %s3334_s15  ;;  %s391_s29 = scalar_lea.hbm %s3893_s2, %s3334_s15 }
  0x37   : > { %s352_s22 = sshll.u32 %s350_s9, 4  ;;  %s393_s26 = sshll.u32 %s391_s29, 4  ;;  %s353_s22 = int_to_ptr.hbm [resolvable:$true] %s352_s22  ;;  %s394_s26 = int_to_ptr.hbm [resolvable:$true] %s393_s26 }
  0x38   : > { %2698 = dma.hbm_to_vmem [thread:$0]  (!%p3336_p11), %s353_s22, 128, %s355_s23, %s342_s5  }
  0x39   : > { %s385_s6 = scalar_lea.vmem [#allocation11], %s3331_s12  ;;  %s412_s9 = scalar_lea.hbm %s3894_s3, %s3334_s15 }
  0x3a   : > { %s395_s1 = sshll.u32 %s385_s6, 4  ;;  %s414_s19 = sshll.u32 %s412_s9, 4  ;;  %s396_s1 = int_to_ptr.vmem [resolvable:$true] %s395_s1  ;;  %s415_s19 = int_to_ptr.hbm [resolvable:$true] %s414_s19 }
  0x3b   : > { %2704 = dma.hbm_to_vmem [thread:$0]  (!%p3336_p11), %s394_s26, 128, %s396_s1, %s362_s14  }
  0x3c   : > { %s406_s24 = scalar_lea.vmem [#allocation12], %s3331_s12  ;;  %s3930_s22 = sand.u32 1, %s3176_s10  }
  0x3d   : > { %s416_s0 = sshll.u32 %s406_s24, 4  ;;  %s403_s23 = scalar_lea.sflag [#allocation13], %s3930_s22  ;;  %s417_s0 = int_to_ptr.vmem [resolvable:$true] %s416_s0 }
  0x3e   : > { %2707 = dma.hbm_to_vmem [thread:$0]  (!%p3336_p11), %s415_s19, 128, %s417_s0, %s403_s23  }
  0x3f   : > { %425 = sbr.rel (%p3291_p8) target bundleno = 1315 (0x523), region = 52  ;;  %s3387_s7 = sand.u32 (!%p3291_p8), 1, %s3160_s28  }
  0x40   : > { %s3390_s14 = sshll.u32 (!%p3291_p8), %s3387_s7, 3  ;;  %s428_s12 = scalar_lea.sflag (!%p3291_p8), [#allocation7], %s3387_s7 }
  0x41   : > { %s431_s15 = scalar_lea.vmem (!%p3291_p8), [#allocation6], %s3390_s14 }
  0x44   : > { %3131 = dma.done.wait (%p3278_p4), %s428_s12, 128  }
  0x45   : > { %3133 = vsyncadd (%p3278_p4), %s428_s12, 4294967168  ;;  %s437_s0 = sand.u32 1, %s3269_s11   ;;  %s441_s16 = scalar_lea.vmem [#allocation9], %s3390_s14 }
  0x46   : > { %s438_s18 = scalar_lea.sflag [#allocation10], %s437_s0 }
  0x47   : > { %3135 = dma.done.wait (%p3278_p4), %s438_s18, 256  }
  0x48   : > { %3137 = vsyncadd (%p3278_p4), %s438_s18, 4294967040  ;;  %s451_s5 = scalar_lea.vmem [#allocation11], %s3390_s14  ;;  %s458_s21 = scalar_lea.sflag [#allocation13], %s437_s0 }
  0x49   : > { %s461_s29 = scalar_lea.vmem [#allocation12], %s3390_s14 }
  0x4a   : > { %3139 = dma.done.wait (%p3278_p4), %s458_s21, 128  }
  0x4b   : > { %3141 = vsyncadd (%p3278_p4), %s458_s21, 4294967168 }
  0x4c   : > { %3143 = dma.done.wait (%p73_p1), [#allocation13], 256  }
  0x4d   : > { %3145 = vsyncadd (%p73_p1), [#allocation13], 4294967040 }
  0x4e   : > { %3147 = dma.done.wait (%p73_p1), [#allocation16], 5376  }
  0x4f   : > { %3149 = vsyncadd (%p73_p1), [#allocation16], 4294961920  ;;  %v621_v0 = vlaneseq  ;;  %v3419_v2 = vld [vmem:[%s451_s5] sm:$0xff]  ;;  %v3185_v21 = vmov 683565275   ;;  %s2609_s26 = sshll.u32 %s3168_s30, 3 }
  0x50   : > { %v662_v3 = vperm.slane %v3419_v2, 6  ;;  %v3423_v4 = vmul.f32 0.3926991, %v3419_v2  ;;  %v648_v5 = vperm.slane %v3419_v2, 4  ;;  %v620_v7 = vperm.slane %v3419_v2, 0  ;;  %s2206_s25 = scalar_lea.hbm %s3899_s8, %s2609_s26  ;;  %s524_s20 = scalar_lea.vmem [#allocation18], %s3390_s14 }
  0x51   : > { %v622_v1 = vshrl.u32 %v621_v0, 7  ;;  %v669_v12 = vperm.slane %v3419_v2, 7  ;;  %v655_v13 = vperm.slane %v3419_v2, 5  ;;  %v627_v14 = vperm.slane %v3419_v2, 1  ;;  %s2208_s9 = sshll.u32 %s524_s20, 4  ;;  %s2210_s19 = sshll.u32 %s2206_s25, 4  ;;  %s2209_s9 = int_to_ptr.vmem [resolvable:$true] %s2208_s9  ;;  %s2211_s19 = int_to_ptr.hbm [resolvable:$true] %s2210_s19 }
  0x52   : > { %v1089_v6 = vand.u32 2139095040, %v3423_v4  ;;  %v1086_v9 = vand.u32 2147483647, %v3423_v4  ;;  %v3186_v23 = vmov 2475754826   ;;  %v641_v27 = vperm.slane %v3419_v2, 3 }
  0x53   : > { %2784 = vset.pattern.permute.xlu1 %v622_v1  ;;  %2783 = vset.pattern.permute.xlu0 %v622_v1  ;;  %v3187_v25 = vmov 2131351028   ;;  %v3188_v28 = vmov 2102212464   ;;  %v3189_v30 = vmov 920167782  }
  0x54   : > { %2785 = vset.pattern.permute.xlu2 %v622_v1  ;;  %v1090_v8 = vshrl.u32 %v1089_v6, 23  ;;  %v1093_v15 = vand.u32 8388607, %v1086_v9  ;;  %v634_v32 = vperm.slane %v3419_v2, 2  ;;  %v3190_v37 = vmov 1326507024  }
  0x55   : > { %vm1088_vm12 = vcmp.lt.s32.totalorder %v3423_v4, 0  ;;  %vm3474_vm13 = vcmp.le.f32.partialorder %v1086_v9, 0.7853982  ;;  %s2195_s30 = scalar_lea.sflag [#allocation8], %s3387_s7  ;;  %s3092_s24 = sshra.s32 %s2211_s19, 4  ;;  %s3093_s24 = int_to_ptr.hbm [resolvable:$true] %s3092_s24 }
  0x56   : > { %v2505_v10 = vadd.s32 4294967169, %v1090_v8  ;;  %v1094_v19 = vor.u32 8388608, %v1093_v15  ;;  %v3191_v15 = vmov 0   ;;  %s3094_s22 = scalar_lea.hbm %s3093_s24, 8  ;;  %p3099_p8 = scmp.lt.s32.totalorder %s3093_s24, %s3899_s8 }
  0x57   : > { %p3095_p1 = scmp.ne.s32.totalorder %s3093_s24, %s3094_s22 }
  0x58   : > { %v1096_v11 = vadd.s32 1, %v2505_v10  ;;  %v3439_v39 = vshll.u32 %v1094_v19, 8 }
  0x59   : > { %p3096_p2 = pnand %p3095_p1, %p3324_p7 }
  0x5a   : > { %vm1097_vm0 = vcmp.gt.s32.totalorder %v1096_v11, 0  ;;  %v1135_v51 = vand.u32 65535, %v3439_v39  ;;  %v1136_v52 = vshrl.u32 %v3439_v39, 16 }
  0x5b   : > { %667 = vperm.xlu1 %2784, %v662_v3   ;;  %653 = vperm.xlu0 %2783, %v648_v5   ;;  %v1098_v16 = vsel %vm1097_vm0, %v1096_v11, 0  ;;  %p3097_p4 = pneg %p3096_p2 }
  0x5c   : > { %625 = vperm.xlu2 %2785, %v620_v7   ;;  %v1100_v17 = vand.u32 31, %v1098_v16  ;;  %v3434_v18 = vshrl.u32 %v1098_v16, 5 }
  0x5e   : > { %v1101_v20 = vsub.s32 32, %v1100_v17  ;;  %v1103_v22 = vshll.u32 %v3185_v21, %v1100_v17  ;;  %v1106_v24 = vshll.u32 %v3186_v23, %v1100_v17  ;;  %v1109_v26 = vshll.u32 %v3187_v25, %v1100_v17 }
  0x5f   : > { %v1112_v29 = vshll.u32 %v3188_v28, %v1100_v17  ;;  %v1115_v31 = vshll.u32 %v3189_v30, %v1100_v17  ;;  %vm1118_vm1 = vcmp.lt.s32.totalorder %v3434_v18, 1  ;;  %vm1121_vm2 = vcmp.lt.s32.totalorder %v3434_v18, 4 }
  0x60   : > { %v1104_v33 = vshrl.u32 %v3186_v23, %v1101_v20  ;;  %v1107_v34 = vshrl.u32 %v3187_v25, %v1101_v20  ;;  %v1110_v35 = vshrl.u32 %v3188_v28, %v1101_v20  ;;  %v1113_v36 = vshrl.u32 %v3189_v30, %v1101_v20 }
  0x61   : > { %v1116_v38 = vshrl.u32 %v3190_v37, %v1101_v20  ;;  %vm1120_vm3 = vcmp.lt.s32.totalorder %v3434_v18, 3  ;;  %vm1119_vm4 = vcmp.lt.s32.totalorder %v3434_v18, 2  ;;  %v1102_v59 = vshrl.u32 %v3185_v21, %v1101_v20 }
  0x62   : > { %v1105_v40 = vor.u32 %v1104_v33, %v1103_v22  ;;  %v1108_v41 = vor.u32 %v1107_v34, %v1106_v24  ;;  %v1111_v42 = vor.u32 %v1110_v35, %v1109_v26  ;;  %v1114_v43 = vor.u32 %v1113_v36, %v1112_v29 }
  0x63   : > { %674 = vperm.xlu1 %2784, %v669_v12   ;;  %660 = vperm.xlu0 %2783, %v655_v13   ;;  %v1117_v44 = vor.u32 %v1116_v38, %v1115_v31 }
  0x64   : > { %632 = vperm.xlu2 %2785, %v627_v14   ;;  %v1126_v45 = vsel %vm1118_vm1, %v1105_v40, %v1108_v41  ;;  %v1130_v46 = vsel %vm1118_vm1, %v1108_v41, %v1111_v42  ;;  %v1127_v47 = vsel %vm1121_vm2, %v1114_v43, 920167782  ;;  %v1122_v12 = vsel %vm1118_vm1, %v1102_v59, %v1105_v40 }
  0x65   : > { %v1131_v48 = vsel %vm1121_vm2, %v1117_v44, 1326507024  ;;  %v1128_v49 = vsel %vm1120_vm3, %v1111_v42, %v1127_v47  ;;  %v1123_v14 = vsel %vm1121_vm2, %v1111_v42, 2102212464  ;;  %vm1229_vm1 = vweird.f32 %v3423_v4 }
  0x66   : > { %v1132_v50 = vsel %vm1120_vm3, %v1114_v43, %v1131_v48  ;;  %v1129_v53 = vsel %vm1119_vm4, %v1126_v45, %v1128_v49  ;;  %v1124_v25 = vsel %vm1120_vm3, %v1108_v41, %v1123_v14  ;;  %vm1242_vm2 = vcmp.lt.f32.partialorder %v3419_v2, 8.0 }
  0x67   : > { %v1133_v54 = vsel %vm1119_vm4, %v1130_v46, %v1132_v50  ;;  %v1159_v57 = vand.u32 65535, %v1129_v53  ;;  %v1160_v58 = vshrl.u32 %v1129_v53, 16  ;;  %v1125_v33 = vsel %vm1119_vm4, %v1122_v12, %v1124_v25 }
  0x68   : > { %v1137_v55 = vand.u32 65535, %v1133_v54  ;;  %v1138_v56 = vshrl.u32 %v1133_v54, 16  ;;  %v1179_v37 = vmul.u32 %v3439_v39, %v1125_v33  ;;  %vm735_vm3 = vcmask 130048  }
  0x69   : > { %v1161_v63 = vmul.u32 %v1159_v57, %v1135_v51  ;;  %v1162_v1 = vmul.u32 %v1160_v58, %v1135_v51  ;;  %v1163_v3 = vmul.u32 %v1159_v57, %v1136_v52  ;;  %v1164_v8 = vmul.u32 %v1160_v58, %v1136_v52 }
  0x6a   : > { %v1139_v60 = vmul.u32 %v1137_v55, %v1135_v51  ;;  %v1140_v61 = vmul.u32 %v1138_v56, %v1135_v51  ;;  %v1141_v62 = vmul.u32 %v1137_v55, %v1136_v52  ;;  %v1142_v5 = vmul.u32 %v1138_v56, %v1136_v52 }
  0x6b   : > { %646 = vperm.xlu1 %2784, %v641_v27   ;;  %639 = vperm.xlu0 %2783, %v634_v32   ;;  %v1165_v10 = vshll.u32 %v1162_v1, 16  ;;  %v1167_v11 = vshll.u32 %v1163_v3, 16  ;;  %v1166_v23 = vshrl.u32 %v1162_v1, 16  ;;  %v1168_v29 = vshrl.u32 %v1163_v3, 16 }
  0x6c   : > { %v1143_v6 = vshll.u32 %v1140_v61, 16  ;;  %v1145_v7 = vshll.u32 %v1141_v62, 16  ;;  %v1144_v19 = vshrl.u32 %v1140_v61, 16  ;;  %v1146_v26 = vshrl.u32 %v1141_v62, 16 }
  0x6d   : > { %vm1169_vm6 = vc.u32 %v1161_v63, %v1165_v10  ;;  %v1171_v17 = vadd.s32 %v1165_v10, %v1161_v63 }
  0x6e   : > { %vm1147_vm5 = vc.u32 %v1139_v60, %v1143_v6  ;;  %v1149_v13 = vadd.s32 %v1143_v6, %v1139_v60  ;;  %v1170_v21 = vsel %vm1169_vm6, 1, %v3191_v15 }
  0x6f   : > { %v1148_v16 = vsel %vm1147_vm5, 1, %v3191_v15  ;;  %v1172_v24 = vadd.s32 %v1170_v21, %v1164_v8  ;;  %vm1173_vm8 = vc.u32 %v1171_v17, %v1167_v11  ;;  %v1175_v32 = vadd.s32 %v1171_v17, %v1167_v11 }
  0x70   : > { %v1150_v20 = vadd.s32 %v1148_v16, %v1142_v5  ;;  %vm1151_vm7 = vc.u32 %v1149_v13, %v1145_v7  ;;  %v1174_v28 = vsel %vm1173_vm8, 1, %v3191_v15 }
  0x71   : > { %v1152_v22 = vsel %vm1151_vm7, 1, %v3191_v15  ;;  %v1176_v30 = vadd.s32 %v1174_v28, %v1172_v24 }
  0x72   : > { %v1154_v27 = vadd.s32 %v1152_v22, %v1150_v20  ;;  %v3486_v22 = vld [vmem:[%s3895_s4] ss:$0 sm:$0xff] }
  0x73   : > { %v1177_v34 = vadd.s32 %v1176_v30, %v1166_v23 }
  0x74   : > { %v1155_v31 = vadd.s32 %v1154_v27, %v1144_v19 }
  0x75   : > { %v1178_v36 = vadd.s32 %v1177_v34, %v1168_v29  ;;  %v2451_v34 = vld [vmem:[#allocation14] sm:$0xf] }
  0x76   : > { %v1156_v35 = vadd.s32 %v1155_v31, %v1146_v26 }
  0x77   : > { %v1182_v38 = vadd.s32 1, %v1178_v36 }
  0x78   : > { %vm1181_vm9 = vc.u32 %v1156_v35, %v1175_v32  ;;  %v1180_v18 = vadd.s32 %v1175_v32, %v1156_v35  ;;  %v2621_v35 = vld [vmem:[#allocation14 + $0x4] sm:$0xf0] }
  0x79   : > { %v1183_v40 = vsel %vm1181_vm9, %v1182_v38, %v1178_v36  ;;  %v529_v36 = vld [vmem:[%s461_s29] sm:$0xff] }
  0x7a   : > { %v1184_v42 = vadd.s32 %v1183_v40, %v1179_v37  ;;  %v2452_v40 = vor.u32 %v2621_v35, %v2451_v34 }
  0x7c   : > { %v1185_v41 = vadd.s32 536870912, %v1184_v42  ;;  %755 = vmatpush.bf16.msra.mxu1 %v2452_v40  ;;  %2654 = vmatpush.bf16.msra.mxu2 %v2452_v40 }
  0x7e   : > { %v1186_v43 = vshrl.u32 %v1185_v41, 30 }
  0x80   : > { %v1187_v44 = vshll.u32 %v1186_v43, 30  ;;  %v1210_v1 = vsub.s32 4, %v1186_v43 }
  0x82   : > { %v1188_v45 = vsub.s32 %v1184_v42, %v1187_v44  ;;  %v1211_v8 = vsel %vm1088_vm12, %v1210_v1, %v1186_v43 }
  0x83   : > { %v1213_v12 = vsel %vm3474_vm13, 0, %v1211_v8  ;;  %v1710_v8 = vperm.slane %v529_v36, 0 }
  0x84   : > { %vm1189_vm10 = vcmp.lt.s32.totalorder %v1188_v45, 0  ;;  %v1190_v46 = vsub.s32 0, %v1188_v45  ;;  %v1230_v16 = vand.u32 3, %v1213_v12 }
  0x86   : > { %v1191_v47 = vsel %vm1189_vm10, %v1190_v46, %v1188_v45  ;;  %vm1235_vm14 = vcmp.eq.s32.totalorder %v1230_v16, 2  ;;  %vm1232_vm15 = vcmp.eq.s32.totalorder %v1230_v16, 0  ;;  %vm1231_vm0 = vcmp.lt.s32.totalorder %v1230_v16, 2 }
  0x87   : > { %v1192_v48 = vclz %v1191_v47 }
  0x89   : > { %v2506_v49 = vadd.s32 4294967294, %v1192_v48 }
  0x8b   : > { %vm2507_vm11 = vcmp.lt.s32.totalorder %v2506_v49, 0 }
  0x8c   : > { %v1195_v50 = vsel %vm2507_vm11, 0, %v2506_v49 }
  0x8d   : > { %v1196_v51 = vsub.s32 32, %v1195_v50  ;;  %v1197_v52 = vshll.u32 %v1188_v45, %v1195_v50  ;;  %v1200_v53 = vsub.s32 4294967266, %v1195_v50 }
  0x8f   : > { %v1198_v39 = vshrl.u32 %v1180_v18, %v1196_v51  ;;  %v1201_v54 = vadd.s32 127, %v1200_v53  ;;  %v2620_v51 = vld [vmem:[#allocation14 + $0x4] sm:$0xf] }
  0x91   : > { %v1199_v55 = vor.u32 %v1198_v39, %v1197_v52  ;;  %v1202_v56 = vshll.u32 %v1201_v54, 23  ;;  %v2453_v52 = vld [vmem:[#allocation14 + $0x8] sm:$0xf0] }
  0x92   : > { %v2456_v39 = vor.u32 %v2620_v51, %v2453_v52  ;;  %v2491_v51 = vld [vmem:[#allocation15 + $0xa0] sm:$0xf]  ;;  %v2626_v52 = vld [vmem:[#allocation15 + $0xb0] sm:$0xf0] }
  0x93   : > { %v1203_v57 = vor.u32 4788187, %v1202_v56  ;;  %v1206_v58 = vcvt.s32.f32 %v1199_v55 }
  0x94   : > { %784 = vmatpush.bf16.msrb.mxu2 %v2456_v39  ;;  %v2492_v39 = vor.u32 %v2626_v52, %v2491_v51 }
  0x95   : > { %v1204_v59 = vand.u32 2147483647, %v1203_v57 }
  0x97   : > { %v1207_v60 = vmul.f32 %v1206_v58, %v1204_v59 }
  0x99   : > { %v1208_v62 = vxor.u32 2147483648, %v1207_v60 }
  0x9b   : > { %v1209_v63 = vsel %vm1088_vm12, %v1208_v62, %v1207_v60  ;;  %v1717_v60 = vperm.slane %v529_v36, 1 }
  0x9c   : > { %v1212_v3 = vsel %vm3474_vm13, %v3423_v4, %v1209_v63 }
  0x9d   : > { %v1214_v5 = vmul.f32 %v1212_v3, %v1212_v3 }
  0x9f   : > { %v1215_v6 = vmul.f32 -0.001358992, %v1214_v5  ;;  %v1222_v7 = vmul.f32 -0.00019511016, %v1214_v5 }
  0xa1   : > { %v1216_v10 = vadd.f32 0.041655596, %v1215_v6  ;;  %v1223_v11 = vadd.f32 0.008332121, %v1222_v7 }
  0xa3   : > { %v1217_v9 = vmul.f32 %v1216_v10, %v1214_v5  ;;  %v1224_v13 = vmul.f32 %v1223_v11, %v1214_v5  ;;  %v1724_v10 = vperm.slane %v529_v36, 2 }
  0xa5   : > { %v1218_v14 = vadd.f32 -0.4999988, %v1217_v9  ;;  %v1225_v15 = vadd.f32 -0.16666654, %v1224_v13 }
  0xa7   : > { %v1219_v17 = vmul.f32 %v1218_v14, %v1214_v5  ;;  %v1226_v19 = vmul.f32 %v1225_v15, %v1214_v5 }
  0xa9   : > { %v1220_v20 = vadd.f32 1.0, %v1219_v17  ;;  %v1227_v21 = vadd.f32 1.0, %v1226_v19 }
  0xab   : > { %v1228_v23 = vmul.f32 %v1227_v21, %v1212_v3  ;;  %v1236_v24 = vxor.u32 2147483648, %v1220_v20 }
  0xad   : > { %v1233_v25 = vxor.u32 2147483648, %v1228_v23  ;;  %v1237_v26 = vsel %vm1235_vm14, %v1236_v24, %v1228_v23 }
  0xaf   : > { %v1234_v29 = vsel %vm1232_vm15, %v1220_v20, %v1233_v25 }
  0xb0   : > { %v1238_v30 = vsel %vm1231_vm0, %v1234_v29, %v1237_v26 }
  0xb1   : > { %v1239_v32 = vsel %vm1229_vm1, nan, %v1238_v30 }
  0xb2   : > { %v1240_v33 = vadd.f32 1.0, %v1239_v32 }
  0xb4   : > { %v1241_v37 = vmul.f32 0.5, %v1240_v33 }
  0xb6   : > { %v626_v27 = vpop.permute.xlu2 %625  ;;  %v1243_v41 = vsel %vm1242_vm2, %v1241_v37, 0.0 }
  0xb7   : > { %v679_v28 = vsub.f32 %v626_v27, %v3486_v22  ;;  %v1244_v43 = vmul.f32 %v1243_v41, %v529_v36 }
  0xb9   : > { %v687_v31 = vmul.f32 -0.5, %v679_v28  ;;  %v1259_v46 = vperm.slane %v1244_v43, 2  ;;  %v1252_v47 = vperm.slane %v1244_v43, 1  ;;  %v1245_v48 = vperm.slane %v1244_v43, 0 }
  0xba   : > { %v1294_v18 = vperm.slane %v1244_v43, 7  ;;  %v1287_v50 = vperm.slane %v1244_v43, 6  ;;  %v1266_v53 = vperm.slane %v1244_v43, 3  ;;  %v1280_v61 = vperm.slane %v1244_v43, 5 }
  0xbb   : > { %v695_v38 = vmul.f32 %v687_v31, %v679_v28  ;;  %1264 = vperm.xlu1 %2784, %v1259_v46   ;;  %1257 = vperm.xlu0 %2783, %v1252_v47   ;;  %v1273_v62 = vperm.slane %v1244_v43, 4  ;;  %v2503_v43 = vld [vmem:[#allocation15 + $0x118] sm:$0xf]  ;;  %v2499_v46 = vld [vmem:[#allocation15 + $0xf0] sm:$0xf] }
  0xbc   : > { %1250 = vperm.xlu2 %2785, %v1245_v48   ;;  %v2628_v47 = vld [vmem:[#allocation15 + $0x100] sm:$0xf0] }
  0xbd   : > { %v703_v44 = vmul.f32 1.442695, %v695_v38 }
  0xbe   : > { %v633_v42 = vpop.permute.xlu2 %632 }
  0xbf   : > { %v680_v4 = vsub.f32 %v633_v42, %v3486_v22  ;;  %2796 = vpow2.f32 %v703_v44  ;;  %v2629_v44 = vld [vmem:[#allocation15 + $0x128] sm:$0xf0] }
  0xc1   : > { %v688_v45 = vmul.f32 -0.5, %v680_v4 }
  0xc3   : > { %v696_v2 = vmul.f32 %v688_v45, %v680_v4  ;;  %1299 = vperm.xlu1 %2784, %v1294_v18   ;;  %1292 = vperm.xlu0 %2783, %v1287_v50   ;;  %v2504_v45 = vor.u32 %v2629_v44, %v2503_v43  ;;  %v2627_v18 = vld [vmem:[#allocation15 + $0xd8] sm:$0xf0] }
  0xc4   : > { %1271 = vperm.xlu2 %2785, %v1266_v53  }
  0xc5   : > { %v705_v49 = vmul.f32 1.442695, %v696_v2  ;;  %v2797_v54 = vpop.eup %2796  ;;  %1048 = vmatpush.bf16.msra.mxu3 %v2504_v45  ;;  %v2500_v2 = vor.u32 %v2628_v47, %v2499_v46 }
  0xc7   : > { %2798 = vpow2.f32 %v705_v49  ;;  %v2495_v49 = vld [vmem:[#allocation15 + $0xc8] sm:$0xf] }
  0xc8   : > { %v2496_v50 = vor.u32 %v2627_v18, %v2495_v49 }
  0xc9   : > { %1049 = vmatpush.bf16.msra.mxu3 %v2500_v2 }
  0xcb   : > { %1722 = vperm.xlu1 %2784, %v1717_v60   ;;  %1285 = vperm.xlu0 %2783, %v1280_v61  }
  0xcc   : > { %1278 = vperm.xlu2 %2785, %v1273_v62  }
  0xcd   : > { %v2799_v55 = vpop.eup %2798  ;;  %v668_v56 = vpop.permute.xlu1 %667  ;;  %1050 = vmatpush.bf16.msra.mxu3 %v2496_v50 }
  0xce   : > { %v654_v57 = vpop.permute.xlu0 %653  ;;  %v719_v59 = vpack.c.bf16 %v2799_v55, %v2797_v54  ;;  %v685_v9 = vsub.f32 %v668_v56, %v3486_v22  ;;  %v2487_v54 = vld [vmem:[#allocation15 + $0x78] sm:$0xf]  ;;  %v2625_v55 = vld [vmem:[#allocation15 + $0x88] sm:$0xf0] }
  0xcf   : > { %v683_v58 = vsub.f32 %v654_v57, %v3486_v22  ;;  %v2488_v56 = vor.u32 %v2625_v55, %v2487_v54  ;;  %v3516_v57 = vld [vmem:[#allocation17 + $0x1] ss:$0 sm:$0xff] }
  0xd0   : > { %2457 = vmatmul.msk.bf16.vlgmr.msra.gmra.mxu1 %vm735_vm3, %v719_v59  ;;  %v693_v20 = vmul.f32 -0.5, %v685_v9 }
  0xd1   : > { %v691_v63 = vmul.f32 -0.5, %v683_v58  ;;  %1051 = vmatpush.bf16.msra.mxu3 %v2492_v39 }
  0xd2   : > { %v701_v28 = vmul.f32 %v693_v20, %v685_v9 }
  0xd3   : > { %v699_v5 = vmul.f32 %v691_v63, %v683_v58  ;;  %1715 = vperm.xlu0 %2783, %v1710_v8   ;;  %v2483_v58 = vld [vmem:[#allocation15 + $0x50] sm:$0xf]  ;;  %v2475_v8 = vld [vmem:[#allocation15] sm:$0xf] }
  0xd4   : > { %1729 = vperm.xlu2 %2785, %v1724_v10   ;;  %v715_v34 = vmul.f32 1.442695, %v701_v28  ;;  %v2622_v10 = vld [vmem:[#allocation15 + $0x10] sm:$0xf0] }
  0xd5   : > { %v675_v1 = vpop.permute.xlu1 %674  ;;  %v711_v11 = vmul.f32 1.442695, %v699_v5  ;;  %1052 = vmatpush.bf16.msra.mxu3 %v2488_v56 }
  0xd6   : > { %v661_v3 = vpop.permute.xlu0 %660  ;;  %v686_v14 = vsub.f32 %v675_v1, %v3486_v22  ;;  %v2479_v1 = vld [vmem:[#allocation15 + $0x28] sm:$0xf] }
  0xd7   : > { %v684_v6 = vsub.f32 %v661_v3, %v3486_v22  ;;  %2800 = vpow2.f32 %v711_v11  ;;  %v2623_v3 = vld [vmem:[#allocation15 + $0x38] sm:$0xf0] }
  0xd8   : > { %v694_v24 = vmul.f32 -0.5, %v686_v14 }
  0xd9   : > { %v692_v7 = vmul.f32 -0.5, %v684_v6 }
  0xda   : > { %v702_v32 = vmul.f32 %v694_v24, %v686_v14 }
  0xdb   : > { %v700_v12 = vmul.f32 %v692_v7, %v684_v6  ;;  %v2480_v6 = vor.u32 %v2623_v3, %v2479_v1 }
  0xdd   : > { %v713_v13 = vmul.f32 1.442695, %v700_v12  ;;  %v647_v15 = vpop.permute.xlu1 %646  ;;  %v2801_v27 = vpop.eup %2800  ;;  %v2476_v12 = vor.u32 %v2622_v10, %v2475_v8 }
  0xde   : > { %v640_v16 = vpop.permute.xlu0 %639  ;;  %v682_v17 = vsub.f32 %v647_v15, %v3486_v22 }
  0xdf   : > { %v681_v19 = vsub.f32 %v640_v16, %v3486_v22  ;;  %2802 = vpow2.f32 %v713_v13  ;;  %v717_v22 = vmul.f32 1.442695, %v702_v32 }
  0xe0   : > { %v690_v21 = vmul.f32 -0.5, %v682_v17 }
  0xe1   : > { %v689_v23 = vmul.f32 -0.5, %v681_v19 }
  0xe2   : > { %v698_v25 = vmul.f32 %v690_v21, %v682_v17 }
  0xe3   : > { %v697_v26 = vmul.f32 %v689_v23, %v681_v19 }
  0xe4   : > { %v709_v29 = vmul.f32 1.442695, %v698_v25 }
  0xe5   : > { %v707_v30 = vmul.f32 1.442695, %v697_v26  ;;  %v2803_v31 = vpop.eup %2802 }
  0xe6   : > { %2804 = vpow2.f32 %v709_v29  ;;  %v721_v33 = vpack.c.bf16 %v2803_v31, %v2801_v27 }
  0xe7   : > { %2806 = vpow2.f32 %v707_v30 }
  0xe8   : > { %2459 = vmatmul.msk.bf16.vlgmr.msra.gmra.mxu2 %vm735_vm3, %v721_v33  ;;  %2808 = vpow2.f32 %v715_v34 }
  0xe9   : > { %2810 = vpow2.f32 %v717_v22 }
  0xec   : > { %v2805_v35 = vpop.eup %2804 }
  0xed   : > { %v2807_v36 = vpop.eup %2806 }
  0xee   : > { %v720_v37 = vpack.c.bf16 %v2805_v35, %v2807_v36  ;;  %v2809_v38 = vpop.eup %2808 }
  0xef   : > { %v2811_v40 = vpop.eup %2810 }
  0xf0   : > { %2458 = vmatmul.msk.bf16.gmra.mxu1 %vm735_vm3, %v720_v37  ;;  %v722_v42 = vpack.c.bf16 %v2811_v40, %v2809_v38 }
  0xf8   : > { %2460 = vmatmul.msk.bf16.gmra.mxu2 %vm735_vm3, %v722_v42 }
 0x108   : > { %2461 = vmatmul.msk.bf16.vlgmr.msrb.gmra.mxu2 %vm735_vm3, %v719_v59  ;;  %v2624_v59 = vld [vmem:[#allocation15 + $0x60] sm:$0xf0] }
 0x109   : > { %v2484_v61 = vor.u32 %v2624_v59, %v2483_v58 }
 0x10b   : > { %1053 = vmatpush.bf16.msra.mxu3 %v2484_v61 }
 0x10f   : > { %1054 = vmatpush.bf16.msra.mxu3 %v2480_v6 }
 0x113   : > { %1055 = vmatpush.bf16.msra.mxu3 %v2476_v12 }
 0x118   : > { %2462 = vmatmul.msk.bf16.gmra.mxu2 %vm735_vm3, %v720_v37 }
 0x128   : > { %2463 = vmatmul.msk.bf16.gmra.mxu2 %vm735_vm3, %v721_v33 }
 0x138   : > { %2464 = vmatmul.msk.bf16.gmra.mxu2 %vm735_vm3, %v722_v42 }
 0x16b   : > { %v3508_v41 = vpop.f32.mrf.mxu2 }
 0x173   : > { %v3510_v4 = vpop.f32.mrf.mxu2 }
 0x17b   : > { %v3512_v48 = vpop.f32.mrf.mxu2 }
 0x183   : > { %v3514_v53 = vpop.f32.mrf.mxu2 }
 0x18b   : > { %v786_v60 = vpop.f32.mrf.mxu2 }
 0x18c   : > { %v3519_v62 = vadd.f32 %v3516_v57, %v786_v60 }
 0x18e   : > { %v850_v63 = vand.u32 2147483647, %v3519_v62  ;;  %v826_v37 = vmax.f32 %v3519_v62, 0.0  ;;  %vm834_vm5 = vcmp.ne.f32.partialorder %v3519_v62, %v3519_v62 }
 0x190   : > { %v858_v5 = vsub.f32 0.0, %v850_v63 }
 0x192   : > { %v866_v7 = vmul.f32 1.442695, %v858_v5 }
 0x193   : > { %v788_v11 = vpop.f32.mrf.mxu2 }
 0x194   : > { %2812 = vpow2.f32 %v866_v7  ;;  %v819_v9 = vadd.f32 %v3516_v57, %v788_v11 }
 0x196   : > { %v851_v13 = vand.u32 2147483647, %v819_v9  ;;  %v827_v51 = vmax.f32 %v819_v9, 0.0  ;;  %vm835_vm7 = vcmp.ne.f32.partialorder %v819_v9, %v819_v9 }
 0x198   : > { %v859_v14 = vsub.f32 0.0, %v851_v13 }
 0x19a   : > { %v2813_v15 = vpop.eup %2812  ;;  %v868_v16 = vmul.f32 1.442695, %v859_v14 }
 0x19b   : > { %v791_v17 = vpop.f32.mrf.mxu2  ;;  %v882_v19 = vadd.f32 1.0, %v2813_v15  ;;  %v885_v21 = vmul.f32 -0.5, %v2813_v15  ;;  %v888_v28 = vand.u32 2147483647, %v2813_v15 }
 0x19c   : > { %2814 = vpow2.f32 %v868_v16  ;;  %v3524_v20 = vadd.f32 %v3516_v57, %v791_v17 }
 0x19d   : > { %2816 = vlog2.f32 %v882_v19  ;;  %v886_v25 = vadd.f32 1.0, %v885_v21  ;;  %vm889_vm4 = vcmp.lt.f32.partialorder %v888_v28, 0.0004427343 }
 0x19e   : > { %v852_v23 = vand.u32 2147483647, %v3524_v20  ;;  %v828_v17 = vmax.f32 %v3524_v20, 0.0  ;;  %vm836_vm10 = vcmp.ne.f32.partialorder %v3524_v20, %v3524_v20 }
 0x19f   : > { %v887_v22 = vmul.f32 %v2813_v15, %v886_v25 }
 0x1a0   : > { %v860_v24 = vsub.f32 0.0, %v852_v23 }
 0x1a2   : > { %v2815_v26 = vpop.eup %2814  ;;  %v870_v27 = vmul.f32 1.442695, %v860_v24 }
 0x1a3   : > { %v2817_v29 = vpop.eup %2816  ;;  %v793_v30 = vpop.f32.mrf.mxu2  ;;  %v891_v31 = vadd.f32 1.0, %v2815_v26  ;;  %v894_v34 = vmul.f32 -0.5, %v2815_v26  ;;  %v897_v42 = vand.u32 2147483647, %v2815_v26 }
 0x1a4   : > { %2818 = vpow2.f32 %v870_v27  ;;  %v3528_v32 = vadd.f32 %v3516_v57, %v793_v30  ;;  %v884_v33 = vmul.f32 0.6931472, %v2817_v29 }
 0x1a5   : > { %2820 = vlog2.f32 %v891_v31  ;;  %v895_v40 = vadd.f32 1.0, %v894_v34  ;;  %vm898_vm6 = vcmp.lt.f32.partialorder %v897_v42, 0.0004427343 }
 0x1a6   : > { %v853_v35 = vand.u32 2147483647, %v3528_v32  ;;  %v890_v36 = vsel %vm889_vm4, %v887_v22, %v884_v33  ;;  %v829_v33 = vmax.f32 %v3528_v32, 0.0  ;;  %vm837_vm11 = vcmp.ne.f32.partialorder %v3528_v32, %v3528_v32 }
 0x1a7   : > { %v954_v45 = vadd.f32 %v890_v36, %v826_v37  ;;  %v896_v50 = vmul.f32 %v2815_v26, %v895_v40 }
 0x1a8   : > { %v861_v38 = vsub.f32 0.0, %v853_v35 }
 0x1a9   : > { %v962_v54 = vsel %vm834_vm5, %v3519_v62, %v954_v45 }
 0x1aa   : > { %v2819_v43 = vpop.eup %2818  ;;  %v872_v44 = vmul.f32 1.442695, %v861_v38  ;;  %v2465_v60 = vadd.f32 -0.6931472, %v962_v54 }
 0x1ab   : > { %v2821_v46 = vpop.eup %2820  ;;  %v796_v47 = vpop.f32.mrf.mxu2  ;;  %v900_v2 = vadd.f32 1.0, %v2819_v43  ;;  %v903_v55 = vmul.f32 -0.5, %v2819_v43  ;;  %v906_v7 = vand.u32 2147483647, %v2819_v43 }
 0x1ac   : > { %2822 = vpow2.f32 %v872_v44  ;;  %v3533_v49 = vadd.f32 %v3516_v57, %v796_v47  ;;  %v893_v18 = vmul.f32 0.6931472, %v2821_v46 }
 0x1ad   : > { %2824 = vlog2.f32 %v900_v2  ;;  %v904_v3 = vadd.f32 1.0, %v903_v55  ;;  %vm907_vm8 = vcmp.lt.f32.partialorder %v906_v7, 0.0004427343 }
 0x1ae   : > { %v854_v52 = vand.u32 2147483647, %v3533_v49  ;;  %v899_v39 = vsel %vm898_vm6, %v896_v50, %v893_v18  ;;  %vm838_vm13 = vcmp.ne.f32.partialorder %v3533_v49, %v3533_v49 }
 0x1af   : > { %v955_v56 = vadd.f32 %v899_v39, %v827_v51 }
 0x1b0   : > { %v862_v58 = vsub.f32 0.0, %v854_v52 }
 0x1b1   : > { %v963_v59 = vsel %vm835_vm7, %v819_v9, %v955_v56  ;;  %v905_v9 = vmul.f32 %v2819_v43, %v904_v3  ;;  %v2447_v56 = vld [vmem:[#allocation15 + $0x11c] sm:$0xf] }
 0x1b2   : > { %v2823_v61 = vpop.eup %2822  ;;  %v874_v63 = vmul.f32 1.442695, %v862_v58  ;;  %v2466_v1 = vadd.f32 -0.6931472, %v963_v59  ;;  %v2619_v58 = vld [vmem:[#allocation15 + $0x12c] sm:$0xf0] }
 0x1b3   : > { %v2825_v5 = vpop.eup %2824  ;;  %v798_v6 = vpop.f32.mrf.mxu2  ;;  %v909_v8 = vadd.f32 1.0, %v2823_v61  ;;  %v912_v10 = vmul.f32 -0.5, %v2823_v61  ;;  %v915_v19 = vand.u32 2147483647, %v2823_v61  ;;  %v2443_v59 = vld [vmem:[#allocation15 + $0xf4] sm:$0xf] }
 0x1b4   : > { %2826 = vpow2.f32 %v874_v63  ;;  %v3540_v11 = vadd.f32 %v3516_v57, %v798_v6  ;;  %v978_v62 = vpack.c.bf16 %v2466_v1, %v2465_v60  ;;  %v902_v12 = vmul.f32 0.6931472, %v2825_v5  ;;  %v2618_v60 = vld [vmem:[#allocation15 + $0x104] sm:$0xf0] }
 0x1b5   : > { %2828 = vlog2.f32 %v909_v8  ;;  %v913_v16 = vadd.f32 1.0, %v912_v10  ;;  %vm916_vm9 = vcmp.lt.f32.partialorder %v915_v19, 0.0004427343  ;;  %v2448_v1 = vor.u32 %v2619_v58, %v2447_v56  ;;  %v2641_v56 = vld [vmem:[#allocation15 + $0xe0] sm:$0xf0] }
 0x1b6   : > { %v855_v13 = vand.u32 2147483647, %v3540_v11  ;;  %1056 = vmatmul.bf16.vlgmr.msra.gmra.mxu3 %v978_v62  ;;  %v908_v15 = vsel %vm907_vm8, %v905_v9, %v902_v12  ;;  %v2444_v7 = vor.u32 %v2618_v60, %v2443_v59  ;;  %v2439_v62 = vld [vmem:[#allocation15 + $0xcc] sm:$0xf]  ;;  %v2617_v12 = vld [vmem:[#allocation15 + $0xdc] sm:$0xf0]  ;;  %vm839_vm15 = vcmp.ne.f32.partialorder %v3540_v11, %v3540_v11 }
 0x1b7   : > { %v956_v26 = vadd.f32 %v908_v15, %v828_v17  ;;  %v914_v31 = vmul.f32 %v2823_v61, %v913_v16  ;;  %601 = vmatpush.bf16.msra.mxu0 %v2448_v1  ;;  %v2440_v19 = vor.u32 %v2617_v12, %v2439_v62  ;;  %v2427_v58 = vld [vmem:[#allocation15 + $0x54] sm:$0xf]  ;;  %v2614_v59 = vld [vmem:[#allocation15 + $0x64] sm:$0xf0] }
 0x1b8   : > { %v863_v14 = vsub.f32 0.0, %v855_v13  ;;  %v831_v13 = vmax.f32 %v3540_v11, 0.0 }
 0x1b9   : > { %v964_v36 = vsel %vm836_vm10, %v3524_v20, %v956_v26  ;;  %v2645_v26 = vld [vmem:[#allocation15 + $0x130] sm:$0xf0] }
 0x1ba   : > { %v2827_v21 = vpop.eup %2826  ;;  %v876_v23 = vmul.f32 1.442695, %v863_v14  ;;  %v2467_v45 = vadd.f32 -0.6931472, %v964_v36 }
 0x1bb   : > { %v2829_v24 = vpop.eup %2828  ;;  %v801_v25 = vpop.f32.mrf.mxu2  ;;  %v918_v27 = vadd.f32 1.0, %v2827_v21  ;;  %v921_v28 = vmul.f32 -0.5, %v2827_v21  ;;  %v924_v42 = vand.u32 2147483647, %v2827_v21  ;;  %602 = vmatpush.bf16.msra.mxu0 %v2444_v7 }
 0x1bc   : > { %2830 = vpow2.f32 %v876_v23  ;;  %v3545_v29 = vadd.f32 %v3516_v57, %v801_v25  ;;  %v911_v30 = vmul.f32 0.6931472, %v2829_v24  ;;  %v2616_v23 = vld [vmem:[#allocation15 + $0xb4] sm:$0xf0]  ;;  %v2566_v24 = vld [vmem:[#allocation15 + $0x120] sm:$0xf] }
 0x1bd   : > { %2832 = vlog2.f32 %v918_v27  ;;  %v922_v37 = vadd.f32 1.0, %v921_v28  ;;  %vm925_vm12 = vcmp.lt.f32.partialorder %v924_v42, 0.0004427343  ;;  %v2644_v27 = vld [vmem:[#allocation15 + $0x124] sm:$0xf]  ;;  %v3567_v36 = vor.u32 %v2645_v26, %v2566_v24  ;;  %v526_v26 = vld [vmem:[%s431_s15] sm:$0xff] }
 0x1be   : > { %v856_v34 = vand.u32 2147483647, %v3545_v29  ;;  %v917_v22 = vsel %vm916_vm9, %v914_v31, %v911_v30  ;;  %v2568_v28 = vld [vmem:[#allocation15 + $0x134] sm:$0xf0]  ;;  %v832_v1 = vmax.f32 %v3545_v29, 0.0  ;;  %vm840_vm2 = vcmp.ne.f32.partialorder %v3545_v29, %v3545_v29 }
 0x1bf   : > { %v957_v35 = vadd.f32 %v917_v22, %v829_v33  ;;  %v923_v18 = vmul.f32 %v2827_v21, %v922_v37  ;;  %v2435_v21 = vld [vmem:[#allocation15 + $0xa4] sm:$0xf]  ;;  %v2571_v31 = vor.u32 %v2644_v27, %v2568_v28  ;;  %v2642_v33 = vld [vmem:[#allocation15 + $0xfc] sm:$0xf]  ;;  %v2560_v37 = vld [vmem:[#allocation15 + $0x10c] sm:$0xf0]  ;;  %603 = vmatpush.bf16.msra.mxu0 %v2440_v19  ;;  %2655 = vmatpush.bf16.msrb.mxu3 %v3567_v36 }
 0x1c0   : > { %v864_v38 = vsub.f32 0.0, %v856_v34  ;;  %v2431_v22 = vld [vmem:[#allocation15 + $0x7c] sm:$0xf]  ;;  %v2436_v42 = vor.u32 %v2616_v23, %v2435_v21  ;;  %v2612_v19 = vld [vmem:[#allocation15 + $0x14] sm:$0xf0]  ;;  %v550_v28 = vpack.c.bf16 %v526_v26, %v526_v26 }
 0x1c1   : > { %v965_v40 = vsel %vm837_vm11, %v3528_v32, %v957_v35  ;;  %v830_v32 = vmax.f32 %v3533_v49, 0.0  ;;  %v2615_v35 = vld [vmem:[#allocation15 + $0x8c] sm:$0xf0]  ;;  %1446 = vmatpush.bf16.msrb.mxu1 %v2571_v31  ;;  %v2638_v31 = vld [vmem:[#allocation15 + $0xac] sm:$0xf] }
 0x1c2   : > { %v2831_v43 = vpop.eup %2830  ;;  %v878_v44 = vmul.f32 1.442695, %v864_v38  ;;  %v2468_v46 = vadd.f32 -0.6931472, %v965_v40 }
 0x1c3   : > { %v2833_v47 = vpop.eup %2832  ;;  %v803_v2 = vpop.f32.mrf.mxu2  ;;  %v927_v50 = vadd.f32 1.0, %v2831_v43  ;;  %v930_v51 = vmul.f32 -0.5, %v2831_v43  ;;  %v933_v3 = vand.u32 2147483647, %v2831_v43  ;;  %604 = vmatpush.bf16.msra.mxu0 %v2436_v42  ;;  %v2635_v42 = vld [vmem:[#allocation15 + $0x68] sm:$0xf0] }
 0x1c4   : > { %2834 = vpow2.f32 %v878_v44  ;;  %v3556_v20 = vadd.f32 %v3516_v57, %v803_v2  ;;  %v979_v52 = vpack.c.bf16 %v2468_v46, %v2467_v45  ;;  %v920_v39 = vmul.f32 0.6931472, %v2833_v47  ;;  %v2643_v44 = vld [vmem:[#allocation15 + $0x108] sm:$0xf0] }
 0x1c5   : > { %2836 = vlog2.f32 %v927_v50  ;;  %v931_v63 = vadd.f32 1.0, %v930_v51  ;;  %vm934_vm14 = vcmp.lt.f32.partialorder %v933_v3, 0.0004427343  ;;  %v2563_v2 = vor.u32 %v2642_v33, %v2560_v37 }
 0x1c6   : > { %v857_v54 = vand.u32 2147483647, %v3556_v20  ;;  %1061 = vmatmul.bf16.gmra.mxu3 %v979_v52  ;;  %v926_v55 = vsel %vm925_vm12, %v923_v18, %v920_v39  ;;  %v2640_v18 = vld [vmem:[#allocation15 + $0xd4] sm:$0xf]  ;;  %v2552_v52 = vld [vmem:[#allocation15 + $0xe4] sm:$0xf0]  ;;  %vm841_vm3 = vcmp.ne.f32.partialorder %v3556_v20, %v3556_v20 }
 0x1c7   : > { %v958_v57 = vadd.f32 %v926_v55, %v830_v32  ;;  %v932_v14 = vmul.f32 %v2831_v43, %v931_v63  ;;  %v2558_v43 = vld [vmem:[#allocation15 + $0xf8] sm:$0xf]  ;;  %v2550_v55 = vld [vmem:[#allocation15 + $0xd0] sm:$0xf]  ;;  %1447 = vmatpush.bf16.msrb.mxu1 %v2563_v2  ;;  %v2555_v60 = vor.u32 %v2640_v18, %v2552_v52  ;;  %v2633_v2 = vld [vmem:[#allocation15 + $0x40] sm:$0xf0] }
 0x1c8   : > { %v865_v61 = vsub.f32 0.0, %v857_v54  ;;  %v2559_v39 = vor.u32 %v2643_v44, %v2558_v43  ;;  %v2432_v54 = vor.u32 %v2615_v35, %v2431_v22  ;;  %v2637_v22 = vld [vmem:[#allocation15 + $0x90] sm:$0xf0]  ;;  %v2636_v35 = vld [vmem:[#allocation15 + $0x84] sm:$0xf] }
 0x1c9   : > { %v966_v15 = vsel %vm838_vm13, %v3533_v49, %v958_v57  ;;  %v2551_v57 = vor.u32 %v2641_v56, %v2550_v55  ;;  %v2634_v43 = vld [vmem:[#allocation15 + $0x5c] sm:$0xf]  ;;  %v2632_v18 = vld [vmem:[#allocation15 + $0x34] sm:$0xf]  ;;  %v2510_v52 = vld [vmem:[#allocation15 + $0x8] sm:$0xf] }
 0x1ca   : > { %v2835_v5 = vpop.eup %2834  ;;  %v880_v6 = vmul.f32 1.442695, %v865_v61  ;;  %v2469_v30 = vadd.f32 -0.6931472, %v966_v15  ;;  %2656 = vmatpush.bf16.msrb.mxu3 %v2559_v39  ;;  %605 = vmatpush.bf16.msra.mxu0 %v2432_v54  ;;  %v2512_v55 = vld [vmem:[#allocation15 + $0x1c] sm:$0xf0] }
 0x1cb   : > { %v2837_v8 = vpop.eup %2836  ;;  %v936_v10 = vadd.f32 1.0, %v2835_v5  ;;  %v939_v16 = vmul.f32 -0.5, %v2835_v5  ;;  %v942_v46 = vand.u32 2147483647, %v2835_v5  ;;  %1448 = vmatpush.bf16.msrb.mxu1 %v2555_v60 }
 0x1cc   : > { %2838 = vpow2.f32 %v880_v6  ;;  %v929_v9 = vmul.f32 0.6931472, %v2837_v8  ;;  %v2428_v6 = vor.u32 %v2614_v59, %v2427_v58  ;;  %v2423_v8 = vld [vmem:[#allocation15 + $0x2c] sm:$0xf]  ;;  %v757_v58 = vpop.f32.mrf.mxu1  ;;  %v3581_v59 = vld [vmem:[#allocation17 + $0x2] ss:$0 sm:$0xff] }
 0x1cd   : > { %2840 = vlog2.f32 %v936_v10  ;;  %v940_v34 = vadd.f32 1.0, %v939_v16  ;;  %vm943_vm0 = vcmp.lt.f32.partialorder %v942_v46, 0.0004427343  ;;  %v2613_v10 = vld [vmem:[#allocation15 + $0x3c] sm:$0xf0] }
 0x1ce   : > { %v935_v17 = vsel %vm934_vm14, %v932_v14, %v929_v9  ;;  %2657 = vmatpush.bf16.msrb.mxu3 %v2551_v57  ;;  %606 = vmatpush.bf16.msra.mxu0 %v2428_v6  ;;  %v2424_v14 = vor.u32 %v2613_v10, %v2423_v8  ;;  %v1251_v8 = vpop.permute.xlu2 %1250 }
 0x1cf   : > { %v959_v25 = vadd.f32 %v935_v17, %v831_v13  ;;  %v941_v32 = vmul.f32 %v2835_v5, %v940_v34  ;;  %v833_v13 = vmax.f32 %v3556_v20, 0.0  ;;  %v2419_v17 = vld [vmem:[#allocation15 + $0x4] sm:$0xf]  ;;  %v2534_v34 = vld [vmem:[#allocation15 + $0x80] sm:$0xf] }
 0x1d0   : > { %v2535_v37 = vor.u32 %v2637_v22, %v2534_v34 }
 0x1d1   : > { %v967_v49 = vsel %vm839_vm15, %v3540_v11, %v959_v25  ;;  %v2420_v25 = vor.u32 %v2612_v19, %v2419_v17 }
 0x1d2   : > { %v2839_v38 = vpop.eup %2838  ;;  %v2470_v40 = vadd.f32 -0.6931472, %v967_v49  ;;  %607 = vmatpush.bf16.msra.mxu0 %v2424_v14 }
 0x1d3   : > { %v2841_v45 = vpop.eup %2840  ;;  %v945_v47 = vadd.f32 1.0, %v2839_v38  ;;  %v948_v51 = vmul.f32 -0.5, %v2839_v38  ;;  %v951_v3 = vand.u32 2147483647, %v2839_v38 }
 0x1d4   : > { %v980_v11 = vpack.c.bf16 %v2470_v40, %v2469_v30  ;;  %v938_v50 = vmul.f32 0.6931472, %v2841_v45  ;;  %v2639_v30 = vld [vmem:[#allocation15 + $0xb8] sm:$0xf0]  ;;  %v2528_v45 = vld [vmem:[#allocation15 + $0x6c] sm:$0xf0] }
 0x1d5   : > { %2842 = vlog2.f32 %v945_v47  ;;  %v949_v63 = vadd.f32 1.0, %v948_v51  ;;  %vm952_vm1 = vcmp.lt.f32.partialorder %v951_v3, 0.0004427343  ;;  %v2531_v46 = vor.u32 %v2634_v43, %v2528_v45  ;;  %v2518_v47 = vld [vmem:[#allocation15 + $0x30] sm:$0xf] }
 0x1d6   : > { %1066 = vmatmul.bf16.gmra.mxu3 %v980_v11  ;;  %v944_v61 = vsel %vm943_vm0, %v941_v32, %v938_v50  ;;  %608 = vmatpush.bf16.msra.mxu0 %v2420_v25  ;;  %v2519_v11 = vor.u32 %v2633_v2, %v2518_v47  ;;  %v2520_v50 = vld [vmem:[#allocation15 + $0x44] sm:$0xf0]  ;;  %v2630_v32 = vld [vmem:[#allocation15 + $0xc] sm:$0xf]  ;;  %vm1855_vm0 = vcmask 1041409  }
 0x1d7   : > { %v960_v5 = vadd.f32 %v944_v61, %v832_v1  ;;  %v950_v12 = vmul.f32 %v2839_v38, %v949_v63  ;;  %v2536_v38 = vld [vmem:[#allocation15 + $0x94] sm:$0xf0]  ;;  %v2523_v51 = vor.u32 %v2632_v18, %v2520_v50  ;;  %v2515_v56 = vor.u32 %v2630_v32, %v2512_v55  ;;  %v759_v61 = vpop.f32.mrf.mxu1  ;;  %v2787_v63 = vld [vmem:[#allocation17] ss:$0 sm:$0xff] }
 0x1d8   : > { %v2539_v40 = vor.u32 %v2636_v35, %v2536_v38  ;;  %v808_v3 = vadd.f32 %v2787_v63, %v757_v58  ;;  %v813_v43 = vadd.f32 %v2787_v63, %v3510_v4 }
 0x1d9   : > { %v968_v16 = vsel %vm840_vm2, %v3545_v29, %v960_v5  ;;  %609 = vmatmul.bf16.vlgmr.msra.gmra.mxu0 %v550_v28  ;;  %v2542_v29 = vld [vmem:[#allocation15 + $0xa8] sm:$0xf]  ;;  %vm1857_vm2 = vcmask 1042434  }
 0x1da   : > { %v2471_v23 = vadd.f32 -0.6931472, %v968_v16  ;;  %1417 = vmatpush.bf16.msrb.mxu0 %v3567_v36  ;;  %v2543_v33 = vor.u32 %v2639_v30, %v2542_v29  ;;  %v2526_v36 = vld [vmem:[#allocation15 + $0x58] sm:$0xf]  ;;  %v1265_v29 = vpop.permute.xlu1 %1264 }
 0x1db   : > { %v2843_v7 = vpop.eup %2842  ;;  %v2527_v44 = vor.u32 %v2635_v42, %v2526_v36 }
 0x1dc   : > { %v947_v62 = vmul.f32 0.6931472, %v2843_v7  ;;  %2658 = vmatpush.bf16.msrb.mxu3 %v2543_v33  ;;  %v809_v7 = vadd.f32 %v2787_v63, %v759_v61 }
 0x1de   : > { %v953_v9 = vsel %vm952_vm1, %v950_v12, %v947_v62  ;;  %1418 = vmatpush.bf16.msrb.mxu0 %v2559_v39  ;;  %v2631_v39 = vld [vmem:[#allocation15 + $0x18] sm:$0xf0]  ;;  %v1258_v12 = vpop.permute.xlu0 %1257 }
 0x1df   : > { %v961_v15 = vadd.f32 %v953_v9, %v833_v13  ;;  %v2511_v54 = vor.u32 %v2631_v39, %v2510_v52  ;;  %v762_v13 = vpop.f32.mrf.mxu1  ;;  %v527_v9 = vld [vmem:[%s441_s16] sm:$0xff] }
 0x1e0   : > { %2659 = vmatpush.bf16.msrb.mxu3 %v2535_v37 }
 0x1e1   : > { %v969_v21 = vsel %vm841_vm3, %v3556_v20, %v961_v15  ;;  %v2544_v20 = vld [vmem:[#allocation15 + $0xbc] sm:$0xf0] }
 0x1e2   : > { %v2472_v24 = vadd.f32 -0.6931472, %v969_v21  ;;  %1419 = vmatpush.bf16.msrb.mxu0 %v2551_v57  ;;  %v2547_v49 = vor.u32 %v2638_v31, %v2544_v20 }
 0x1e4   : > { %v981_v27 = vpack.c.bf16 %v2472_v24, %v2471_v23  ;;  %1449 = vmatpush.bf16.msrb.mxu1 %v2547_v49  ;;  %2660 = vmatpush.bf16.msrb.mxu3 %v2527_v44  ;;  %v810_v23 = vadd.f32 %v2787_v63, %v762_v13 }
 0x1e6   : > { %1071 = vmatmul.bf16.gmra.mxu3 %v981_v27  ;;  %1420 = vmatpush.bf16.msrb.mxu0 %v2543_v33  ;;  %v1272_v33 = vpop.permute.xlu2 %1271 }
 0x1e7   : > { %v764_v24 = vpop.f32.mrf.mxu1 }
 0x1e8   : > { %1450 = vmatpush.bf16.msrb.mxu1 %v2539_v40  ;;  %2661 = vmatpush.bf16.msrb.mxu3 %v2519_v11  ;;  %v811_v27 = vadd.f32 %v2787_v63, %v764_v24  ;;  %v812_v40 = vadd.f32 %v2787_v63, %v3508_v41  ;;  %v814_v41 = vadd.f32 %v2787_v63, %v3512_v48 }
 0x1ea   : > { %1421 = vmatpush.bf16.msrb.mxu0 %v2535_v37  ;;  %v1293_v37 = vpop.permute.xlu0 %1292 }
 0x1ec   : > { %1451 = vmatpush.bf16.msrb.mxu1 %v2531_v46  ;;  %2662 = vmatpush.bf16.msrb.mxu3 %v2511_v54 }
 0x1ee   : > { %1422 = vmatpush.bf16.msrb.mxu0 %v2527_v44  ;;  %v1279_v45 = vpop.permute.xlu2 %1278 }
 0x1f0   : > { %1452 = vmatpush.bf16.msrb.mxu1 %v2523_v51 }
 0x1f2   : > { %1423 = vmatpush.bf16.msrb.mxu0 %v2519_v11  ;;  %v1286_v2 = vpop.permute.xlu0 %1285 }
 0x1f4   : > { %1453 = vmatpush.bf16.msrb.mxu1 %v2515_v56  ;;  %v815_v56 = vadd.f32 %v2787_v63, %v3514_v53 }
 0x1f6   : > { %1424 = vmatpush.bf16.msrb.mxu0 %v2511_v54 }
 0x239   : > { %v1057_v60 = vpop.f32.mrf.mxu3 }
 0x23a   : > { %v1058_v1 = vadd.f32 %v3581_v59, %v1057_v60 }
 0x23c   : > { %v1077_v57 = vadd.f32 %v1058_v1, %v808_v3  ;;  %v1300_v1 = vpop.permute.xlu1 %1299 }
 0x23e   : > { %v1301_v10 = vmul.f32 %v1251_v8, %v1077_v57  ;;  %v1529_v8 = vand.u32 127, %v621_v0 }
 0x240   : > { %v1309_v15 = vmul.f32 %v1301_v10, %v527_v9  ;;  %vm1575_vm4 = vcmp.ge.s32.totalorder %v1529_v8, 8  ;;  %vm1576_vm5 = vcmp.lt.s32.totalorder %v1529_v8, 16  ;;  %vm1620_vm6 = vcmp.ge.s32.totalorder %v1529_v8, 16 }
 0x241   : > { %v1059_v6 = vpop.f32.mrf.mxu3  ;;  %vm1621_vm7 = vcmp.lt.s32.totalorder %v1529_v8, 24  ;;  %vm1577_vm8 = vmand %vm1575_vm4, %vm1576_vm5  ;;  %vm1531_vm9 = vcmp.lt.s32.totalorder %v1529_v8, 8  ;;  %vm1665_vm11 = vcmp.ge.s32.totalorder %v1529_v8, 24  ;;  %vm1666_vm12 = vcmp.lt.s32.totalorder %v1529_v8, 32 }
 0x242   : > { %v1060_v5 = vadd.f32 %v3581_v59, %v1059_v6  ;;  %vm1622_vm10 = vmand %vm1620_vm6, %vm1621_vm7 }
 0x243   : > { %vm1667_vm13 = vmand %vm1665_vm11, %vm1666_vm12  ;;  %vm1865_vm11 = vcmask 1046534   ;;  %vm1867_vm12 = vcmask 1047559  }
 0x244   : > { %v1078_v62 = vadd.f32 %v1060_v5, %v809_v7  ;;  %v2790_v5 = vld [vmem:[#allocation17 + $0x3] ss:$0 sm:$0xff] }
 0x246   : > { %v1302_v14 = vmul.f32 %v1258_v12, %v1078_v62  ;;  %v3192_v12 = vmov 0.0  }
 0x247   : > { %v3604_v13 = vsel %vm1531_vm9, 1.0, %v3192_v12  ;;  %v3606_v0 = vsel %vm1577_vm8, 1.0, %v3192_v12  ;;  %vm1859_vm8 = vcmask 1043459   ;;  %vm1861_vm9 = vcmask 1044484  }
 0x248   : > { %v1310_v16 = vmul.f32 %v1302_v14, %v527_v9 }
 0x249   : > { %v1062_v17 = vpop.f32.mrf.mxu3 }
 0x24a   : > { %v1317_v19 = vpack.c.bf16 %v1310_v16, %v1309_v15  ;;  %v1063_v21 = vadd.f32 %v3581_v59, %v1062_v17 }
 0x24c   : > { %1425 = vmatmul.bf16.vlgmr.msrb.gmra.mxu0 %v1317_v19  ;;  %1454 = vmatmul.bf16.vlgmr.msrb.gmra.mxu1 %v1317_v19  ;;  %v1079_v25 = vadd.f32 %v1063_v21, %v810_v23 }
 0x24e   : > { %v1303_v30 = vmul.f32 %v1265_v29, %v1079_v25  ;;  %v3615_v25 = vsel %vm1667_vm13, 1.0, %v3192_v12 }
 0x250   : > { %v1311_v49 = vmul.f32 %v1303_v30, %v527_v9 }
 0x251   : > { %v1064_v26 = vpop.f32.mrf.mxu3 }
 0x252   : > { %v1065_v28 = vadd.f32 %v3581_v59, %v1064_v26 }
 0x254   : > { %v1080_v31 = vadd.f32 %v1065_v28, %v811_v27 }
 0x256   : > { %v1304_v20 = vmul.f32 %v1272_v33, %v1080_v31  ;;  %v610_v11 = vpop.f32.mrf.mxu0 }
 0x257   : > { %v611_v48 = vadd.f32 %v2790_v5, %v610_v11 }
 0x258   : > { %v1312_v34 = vmul.f32 %v1304_v20, %v527_v9 }
 0x259   : > { %v1067_v22 = vpop.f32.mrf.mxu3  ;;  %v3598_v53 = vmul.f32 0.35355338, %v611_v48 }
 0x25a   : > { %v1318_v35 = vpack.c.bf16 %v1312_v34, %v1311_v49  ;;  %v1068_v38 = vadd.f32 %v3581_v59, %v1067_v22 }
 0x25b   : > { %v1504_v62 = vperm.slane %v3598_v53, 0  ;;  %v1497_v19 = vrot.slane %v3598_v53, 1  ;;  %v1498_v29 = vrot.slane %v3598_v53, 2  ;;  %v1503_v8 = vrot.slane %v3598_v53, 7 }
 0x25c   : > { %1430 = vmatmul.bf16.gmra.mxu0 %v1318_v35  ;;  %1459 = vmatmul.bf16.gmra.mxu1 %v1318_v35  ;;  %v1081_v36 = vadd.f32 %v1068_v38, %v812_v40 }
 0x25d   : > { %v1505_v24 = vperm.slane %v1497_v19, 0  ;;  %v1506_v20 = vperm.slane %v1498_v29, 0  ;;  %v3660_v29 = vpop.permute.xlu2 %1729 }
 0x25e   : > { %v1305_v46 = vmul.f32 %v1279_v45, %v1081_v36  ;;  %v612_v54 = vpop.f32.mrf.mxu0  ;;  %vm1768_vm1 = vcmp.gt.f32.partialorder %v3660_v29, 0.0 }
 0x260   : > { %v1313_v50 = vmul.f32 %v1305_v46, %v527_v9 }
 0x261   : > { %v1069_v42 = vpop.f32.mrf.mxu3 }
 0x262   : > { %v1070_v44 = vadd.f32 %v3581_v59, %v1069_v42 }
 0x264   : > { %v1082_v47 = vadd.f32 %v1070_v44, %v813_v43 }
 0x266   : > { %v1306_v18 = vmul.f32 %v1286_v2, %v1082_v47  ;;  %v1500_v47 = vrot.slane %v3598_v53, 4 }
 0x268   : > { %v1314_v51 = vmul.f32 %v1306_v18, %v527_v9 }
 0x269   : > { %v1072_v52 = vpop.f32.mrf.mxu3 }
 0x26a   : > { %v1319_v39 = vpack.c.bf16 %v1314_v51, %v1313_v50  ;;  %v1073_v32 = vadd.f32 %v3581_v59, %v1072_v52  ;;  %v1508_v51 = vperm.slane %v1500_v47, 0 }
 0x26c   : > { %1435 = vmatmul.bf16.gmra.mxu0 %v1319_v39  ;;  %1464 = vmatmul.bf16.gmra.mxu1 %v1319_v39  ;;  %v1083_v4 = vadd.f32 %v1073_v32, %v814_v41  ;;  %v1501_v32 = vrot.slane %v3598_v53, 5 }
 0x26e   : > { %v1307_v60 = vmul.f32 %v1293_v37, %v1083_v4  ;;  %v1499_v37 = vrot.slane %v3598_v53, 3 }
 0x270   : > { %v1315_v57 = vmul.f32 %v1307_v60, %v527_v9  ;;  %v1507_v36 = vperm.slane %v1499_v37, 0  ;;  %v1502_v60 = vrot.slane %v3598_v53, 6 }
 0x271   : > { %v1074_v55 = vpop.f32.mrf.mxu3 }
 0x272   : > { %v1075_v58 = vadd.f32 %v3581_v59, %v1074_v55  ;;  %v3600_v59 = vld [vmem:[#allocation17 + $0x4] ss:$0 sm:$0xff] }
 0x274   : > { %v1084_v61 = vadd.f32 %v1075_v58, %v815_v56  ;;  %v1509_v56 = vperm.slane %v1501_v32, 0 }
 0x276   : > { %v1308_v3 = vmul.f32 %v1300_v1, %v1084_v61 }
 0x278   : > { %v1316_v6 = vmul.f32 %v1308_v3, %v527_v9  ;;  %v3608_v9 = vsel %vm1622_vm10, 1.0, %v3192_v12  ;;  %vm1863_vm10 = vcmask 1045509  }
 0x27a   : > { %v1320_v7 = vpack.c.bf16 %v1316_v6, %v1315_v57 }
 0x27c   : > { %1440 = vmatmul.bf16.vlgmr.msrb.gmra.mxu3 %v1320_v7  ;;  %1469 = vmatmul.bf16.gmra.mxu1 %v1320_v7  ;;  %v1510_v7 = vperm.slane %v1502_v60, 0 }
 0x2c9   : > { %v1426_v63 = vpop.f32.mrf.mxu0 }
 0x2ca   : > { %v1477_v10 = vadd.f32 %v3600_v59, %v1426_v63 }
 0x2cc   : > { %v1520_v14 = vmul.f32 %v1504_v62, %v1477_v10 }
 0x2ce   : > { %v1625_v15 = vmul.f32 %v3608_v9, %v1520_v14  ;;  %v1580_v16 = vmul.f32 %v3606_v0, %v1520_v14  ;;  %v1535_v17 = vmul.f32 %v3604_v13, %v1520_v14  ;;  %v1670_v30 = vmul.f32 %v3615_v25, %v1520_v14 }
 0x2cf   : > { %v1511_v14 = vperm.slane %v1503_v8, 0 }
 0x2d0   : > { %1633 = vadd.xlane.f32.xlu2 %v1625_v15  ;;  %1588 = vadd.xlane.f32.xlu0 %v1580_v16 }
 0x2d1   : > { %1543 = vadd.xlane.f32.xlu1 %v1535_v17  ;;  %v1428_v21 = vpop.f32.mrf.mxu0 }
 0x2d2   : > { %v1478_v23 = vadd.f32 %v3600_v59, %v1428_v21 }
 0x2d4   : > { %v1521_v26 = vmul.f32 %v1505_v24, %v1478_v23 }
 0x2d6   : > { %v1626_v27 = vmul.f32 %v3608_v9, %v1521_v26  ;;  %v1536_v28 = vmul.f32 %v3604_v13, %v1521_v26  ;;  %v1581_v35 = vmul.f32 %v3606_v0, %v1521_v26  ;;  %v1671_v45 = vmul.f32 %v3615_v25, %v1521_v26  ;;  %v2866_v26 = vld [vmem:[%s461_s29] sm:$0xff] }
 0x2d7   : > { %v1759_v37 = vperm.slane %v2866_v26, 7 }
 0x2d8   : > { %1635 = vadd.xlane.f32.xlu0 %v1626_v27  ;;  %1545 = vadd.xlane.f32.xlu2 %v1536_v28  ;;  %v1731_v27 = vperm.slane %v2866_v26, 3  ;;  %v1738_v28 = vperm.slane %v2866_v26, 4 }
 0x2d9   : > { %1678 = vadd.xlane.f32.xlu1 %v1670_v30  ;;  %v1431_v31 = vpop.f32.mrf.mxu0  ;;  %v3662_v30 = vpop.permute.xlu0 %1715 }
 0x2da   : > { %v1479_v33 = vadd.f32 %v3600_v59, %v1431_v31  ;;  %v3664_v31 = vpop.permute.xlu1 %1722  ;;  %vm1766_vm14 = vcmp.gt.f32.partialorder %v3662_v30, 0.0 }
 0x2db   : > { %vm1767_vm15 = vcmp.gt.f32.partialorder %v3664_v31, 0.0 }
 0x2dc   : > { %v1522_v49 = vmul.f32 %v1506_v20, %v1479_v33  ;;  %v1745_v33 = vperm.slane %v2866_v26, 5  ;;  %v1752_v20 = vperm.slane %v2866_v26, 6 }
 0x2de   : > { %v1537_v34 = vmul.f32 %v3604_v13, %v1522_v49  ;;  %v1627_v22 = vmul.f32 %v3608_v9, %v1522_v49  ;;  %v1672_v44 = vmul.f32 %v3615_v25, %v1522_v49  ;;  %v1582_v11 = vmul.f32 %v3606_v0, %v1522_v49 }
 0x2e0   : > { %1637 = vadd.xlane.f32.xlu0 %v1627_v22  ;;  %1590 = vadd.xlane.f32.xlu2 %v1581_v35 }
 0x2e1   : > { %1547 = vadd.xlane.f32.xlu1 %v1537_v34  ;;  %v1433_v38 = vpop.f32.mrf.mxu0 }
 0x2e2   : > { %v1480_v40 = vadd.f32 %v3600_v59, %v1433_v38 }
 0x2e4   : > { %v1523_v42 = vmul.f32 %v1507_v36, %v1480_v40 }
 0x2e6   : > { %v1583_v43 = vmul.f32 %v3606_v0, %v1523_v42  ;;  %v1538_v18 = vmul.f32 %v3604_v13, %v1523_v42  ;;  %v1673_v50 = vmul.f32 %v3615_v25, %v1523_v42  ;;  %v1628_v41 = vmul.f32 %v3608_v9, %v1523_v42 }
 0x2e8   : > { %1682 = vadd.xlane.f32.xlu0 %v1672_v44  ;;  %1680 = vadd.xlane.f32.xlu2 %v1671_v45 }
 0x2e9   : > { %1594 = vadd.xlane.f32.xlu1 %v1583_v43  ;;  %v1436_v46 = vpop.f32.mrf.mxu0 }
 0x2ea   : > { %v1481_v2 = vadd.f32 %v3600_v59, %v1436_v46 }
 0x2ec   : > { %v1524_v52 = vmul.f32 %v1508_v51, %v1481_v2 }
 0x2ee   : > { %v1584_v54 = vmul.f32 %v3606_v0, %v1524_v52  ;;  %v1539_v55 = vmul.f32 %v3604_v13, %v1524_v52  ;;  %v1674_v61 = vmul.f32 %v3615_v25, %v1524_v52  ;;  %v1629_v1 = vmul.f32 %v3608_v9, %v1524_v52 }
 0x2f0   : > { %1549 = vadd.xlane.f32.xlu0 %v1538_v18  ;;  %1592 = vadd.xlane.f32.xlu2 %v1582_v11 }
 0x2f1   : > { %1684 = vadd.xlane.f32.xlu1 %v1673_v50  ;;  %v1438_v39 = vpop.f32.mrf.mxu0 }
 0x2f2   : > { %v1482_v4 = vadd.f32 %v3600_v59, %v1438_v39 }
 0x2f4   : > { %v1525_v58 = vmul.f32 %v1509_v56, %v1482_v4 }
 0x2f6   : > { %v1540_v57 = vmul.f32 %v3604_v13, %v1525_v58  ;;  %v1630_v48 = vmul.f32 %v3608_v9, %v1525_v58  ;;  %v1585_v63 = vmul.f32 %v3606_v0, %v1525_v58  ;;  %v1675_v17 = vmul.f32 %v3615_v25, %v1525_v58 }
 0x2f8   : > { %1639 = vadd.xlane.f32.xlu0 %v1628_v41  ;;  %1596 = vadd.xlane.f32.xlu2 %v1584_v54 }
 0x2f9   : > { %1551 = vadd.xlane.f32.xlu1 %v1539_v55 }
 0x2ff   : > { %v1441_v3 = vpop.f32.mrf.mxu3 }
 0x300   : > { %v1483_v6 = vadd.f32 %v3600_v59, %v1441_v3  ;;  %1686 = vadd.xlane.f32.xlu0 %v1674_v61  ;;  %1641 = vadd.xlane.f32.xlu2 %v1629_v1 }
 0x301   : > { %1553 = vadd.xlane.f32.xlu1 %v1540_v57 }
 0x302   : > { %v1526_v5 = vmul.f32 %v1510_v7, %v1483_v6 }
 0x304   : > { %v1586_v62 = vmul.f32 %v3606_v0, %v1526_v5  ;;  %v1541_v16 = vmul.f32 %v3604_v13, %v1526_v5  ;;  %v1631_v21 = vmul.f32 %v3608_v9, %v1526_v5  ;;  %v1676_v23 = vmul.f32 %v3615_v25, %v1526_v5 }
 0x307   : > { %v1443_v10 = vpop.f32.mrf.mxu3 }
 0x308   : > { %v1484_v12 = vadd.f32 %v3600_v59, %v1443_v10  ;;  %1643 = vadd.xlane.f32.xlu0 %v1630_v48  ;;  %1598 = vadd.xlane.f32.xlu2 %v1585_v63 }
 0x309   : > { %1600 = vadd.xlane.f32.xlu1 %v1586_v62 }
 0x30a   : > { %v1527_v15 = vmul.f32 %v1511_v14, %v1484_v12 }
 0x30c   : > { %v1542_v53 = vmul.f32 %v3604_v13, %v1527_v15  ;;  %v1677_v19 = vmul.f32 %v3615_v25, %v1527_v15  ;;  %v1632_v59 = vmul.f32 %v3608_v9, %v1527_v15  ;;  %v1587_v24 = vmul.f32 %v3606_v0, %v1527_v15 }
 0x310   : > { %1555 = vadd.xlane.f32.xlu0 %v1541_v16  ;;  %1688 = vadd.xlane.f32.xlu2 %v1675_v17 }
 0x311   : > { %1557 = vadd.xlane.f32.xlu1 %v1542_v53 }
 0x318   : > { %1692 = vadd.xlane.f32.xlu0 %v1677_v19  ;;  %1645 = vadd.xlane.f32.xlu2 %v1631_v21 }
 0x319   : > { %1647 = vadd.xlane.f32.xlu1 %v1632_v59 }
 0x320   : > { %1690 = vadd.xlane.f32.xlu2 %v1676_v23 }
 0x328   : > { %1602 = vadd.xlane.f32.xlu2 %v1587_v24 }
 0x332   : > { %1736 = vperm.xlu1 %2784, %v1731_v27  }
 0x33a   : > { %1743 = vperm.xlu1 %2784, %v1738_v28  }
 0x340   : > { %1750 = vperm.xlu2 %2785, %v1745_v33  }
 0x342   : > { %1757 = vperm.xlu1 %2784, %v1752_v20  }
 0x343   : > { %v1634_v49 = vpop.xlane.xlu2 %1633  ;;  %v1589_v34 = vpop.xlane.xlu0 %1588 }
 0x344   : > { %v1604_v22 = vmul.f32 %v3606_v0, %v1589_v34  ;;  %v1544_v35 = vpop.xlane.xlu1 %1543  ;;  %v1649_v40 = vmul.f32 %v3608_v9, %v1634_v49 }
 0x345   : > { %v1559_v38 = vmul.f32 %v3604_v13, %v1544_v35 }
 0x347   : > { %v1612_v36 = vadd.f32 %v1604_v22, %v1559_v38 }
 0x348   : > { %1764 = vperm.xlu2 %2785, %v1759_v37  }
 0x349   : > { %v1657_v42 = vadd.f32 %v1649_v40, %v1612_v36 }
 0x34b   : > { %v1546_v43 = vpop.xlane.xlu2 %1545  ;;  %v1636_v47 = vpop.xlane.xlu0 %1635 }
 0x34c   : > { %v1679_v44 = vpop.xlane.xlu1 %1678  ;;  %v1560_v11 = vmul.f32 %v3604_v13, %v1546_v43  ;;  %v1650_v32 = vmul.f32 %v3608_v9, %v1636_v47  ;;  %v3697_v47 = vpop.f32.mrf.mxu1 }
 0x34d   : > { %v1694_v45 = vmul.f32 %v3615_v25, %v1679_v44 }
 0x34f   : > { %v1702_v46 = vadd.f32 %v1694_v45, %v1657_v42 }
 0x351   : > { %v3671_v18 = vsel %vm1766_vm14, %v1702_v46, -1e+30 }
 0x352   : > { %v1798_v39 = vrot.slane %v3671_v18, 4 }
 0x353   : > { %v1591_v2 = vpop.xlane.xlu2 %1590  ;;  %v1638_v54 = vpop.xlane.xlu0 %1637 }
 0x354   : > { %v1605_v50 = vmul.f32 %v3606_v0, %v1591_v2  ;;  %v1548_v51 = vpop.xlane.xlu1 %1547  ;;  %v1799_v41 = vmax.f32 %v3671_v18, %v1798_v39  ;;  %v1651_v10 = vmul.f32 %v3608_v9, %v1638_v54 }
 0x355   : > { %v1561_v5 = vmul.f32 %v3604_v13, %v1548_v51  ;;  %v3699_v51 = vpop.f32.mrf.mxu1 }
 0x356   : > { %v1613_v52 = vadd.f32 %v1605_v50, %v1560_v11  ;;  %v1800_v60 = vrot.slane %v1799_v41, 2 }
 0x358   : > { %v1658_v55 = vadd.f32 %v1650_v32, %v1613_v52  ;;  %v1801_v57 = vmax.f32 %v1799_v41, %v1800_v60 }
 0x35a   : > { %v1802_v12 = vrot.slane %v1801_v57, 1 }
 0x35b   : > { %v1681_v4 = vpop.xlane.xlu2 %1680  ;;  %v1683_v48 = vpop.xlane.xlu0 %1682 }
 0x35c   : > { %v1695_v56 = vmul.f32 %v3615_v25, %v1681_v4  ;;  %v1595_v61 = vpop.xlane.xlu1 %1594  ;;  %v1696_v15 = vmul.f32 %v3615_v25, %v1683_v48  ;;  %v1803_v21 = vmax.f32 %v1801_v57, %v1802_v12 }
 0x35d   : > { %v1607_v32 = vmul.f32 %v3606_v0, %v1595_v61 }
 0x35e   : > { %v1703_v58 = vadd.f32 %v1695_v56, %v1658_v55 }
 0x360   : > { %v3680_v1 = vsel %vm1767_vm15, %v1703_v58, -1e+30 }
 0x361   : > { %v1804_v3 = vrot.slane %v3680_v1, 4 }
 0x363   : > { %v1805_v6 = vmax.f32 %v3680_v1, %v1804_v3  ;;  %v1593_v7 = vpop.xlane.xlu2 %1592  ;;  %v1550_v34 = vpop.xlane.xlu0 %1549 }
 0x364   : > { %v1606_v8 = vmul.f32 %v3606_v0, %v1593_v7  ;;  %v1685_v53 = vpop.xlane.xlu1 %1684  ;;  %v1562_v52 = vmul.f32 %v3604_v13, %v1550_v34  ;;  %v3708_v7 = vpop.f32.mrf.mxu1 }
 0x365   : > { %v1806_v63 = vrot.slane %v1805_v6, 2 }
 0x366   : > { %v1614_v62 = vadd.f32 %v1606_v8, %v1561_v5  ;;  %v1615_v56 = vadd.f32 %v1607_v32, %v1562_v52  ;;  %v1697_v5 = vmul.f32 %v3615_v25, %v1685_v53 }
 0x367   : > { %v1807_v14 = vmax.f32 %v1805_v6, %v1806_v63 }
 0x368   : > { %v1659_v16 = vadd.f32 %v1651_v10, %v1614_v62 }
 0x369   : > { %v1808_v17 = vrot.slane %v1807_v14, 1 }
 0x36a   : > { %v1704_v19 = vadd.f32 %v1696_v15, %v1659_v16 }
 0x36b   : > { %v1809_v59 = vmax.f32 %v1807_v14, %v1808_v17  ;;  %v1597_v23 = vpop.xlane.xlu2 %1596  ;;  %v1640_v36 = vpop.xlane.xlu0 %1639 }
 0x36c   : > { %v3689_v24 = vsel %vm1768_vm1, %v1704_v19, -1e+30  ;;  %v1552_v22 = vpop.xlane.xlu1 %1551  ;;  %v1652_v41 = vmul.f32 %v3608_v9, %v1640_v36  ;;  %v1608_v8 = vmul.f32 %v3606_v0, %v1597_v23 }
 0x36d   : > { %v1856_v26 = vsel %vm1855_vm0, %v1809_v59, %v1803_v21  ;;  %v1810_v27 = vrot.slane %v3689_v24, 4  ;;  %v1563_v61 = vmul.f32 %v3604_v13, %v1552_v22 }
 0x36e   : > { %v1660_v3 = vadd.f32 %v1652_v41, %v1615_v56 }
 0x36f   : > { %v1811_v28 = vmax.f32 %v3689_v24, %v1810_v27  ;;  %v1616_v53 = vadd.f32 %v1608_v8, %v1563_v61 }
 0x370   : > { %v1705_v12 = vadd.f32 %v1697_v5, %v1660_v3 }
 0x371   : > { %v1812_v33 = vrot.slane %v1811_v28, 2 }
 0x373   : > { %v1813_v20 = vmax.f32 %v1811_v28, %v1812_v33  ;;  %v1642_v49 = vpop.xlane.xlu2 %1641  ;;  %v1687_v44 = vpop.xlane.xlu0 %1686 }
 0x374   : > { %v1554_v42 = vpop.xlane.xlu1 %1553  ;;  %v1653_v14 = vmul.f32 %v3608_v9, %v1642_v49 }
 0x375   : > { %v1814_v35 = vrot.slane %v1813_v20, 1  ;;  %v1564_v58 = vmul.f32 %v3604_v13, %v1554_v42 }
 0x376   : > { %v1661_v27 = vadd.f32 %v1653_v14, %v1616_v53 }
 0x377   : > { %v1815_v37 = vmax.f32 %v1813_v20, %v1814_v35  ;;  %v1698_v20 = vmul.f32 %v3615_v25, %v1687_v44  ;;  %v3733_v35 = vpop.f32.mrf.mxu1 }
 0x379   : > { %v3695_v38 = vsel %vm1857_vm2, %v1815_v37, %v1856_v26  ;;  %v1706_v37 = vadd.f32 %v1698_v20, %v1661_v27 }
 0x37b   : > { %v1599_v40 = vpop.xlane.xlu2 %1598  ;;  %v1644_v2 = vpop.xlane.xlu0 %1643 }
 0x37c   : > { %v1601_v45 = vpop.xlane.xlu1 %1600  ;;  %v1609_v55 = vmul.f32 %v3606_v0, %v1599_v40  ;;  %v1654_v48 = vmul.f32 %v3608_v9, %v1644_v2 }
 0x37e   : > { %v1617_v57 = vadd.f32 %v1609_v55, %v1564_v58 }
 0x37f   : > { %v3756_v3 = vpop.f32.mrf.mxu1 }
 0x380   : > { %v1662_v16 = vadd.f32 %v1654_v48, %v1617_v57 }
 0x383   : > { %v1689_v43 = vpop.xlane.xlu2 %1688  ;;  %v1556_v54 = vpop.xlane.xlu0 %1555 }
 0x384   : > { %v1558_v11 = vpop.xlane.xlu1 %1557  ;;  %v1699_v63 = vmul.f32 %v3615_v25, %v1689_v43  ;;  %v1565_v40 = vmul.f32 %v3604_v13, %v1556_v54  ;;  %v1610_v43 = vmul.f32 %v3606_v0, %v1601_v45 }
 0x385   : > { %v1566_v6 = vmul.f32 %v3604_v13, %v1558_v11 }
 0x386   : > { %v1707_v59 = vadd.f32 %v1699_v63, %v1662_v16  ;;  %v1618_v32 = vadd.f32 %v1610_v43, %v1565_v40  ;;  %v2602_v40 = vld [vmem:[#allocation15 + $0x100] sm:$0xf] }
 0x38b   : > { %v1646_v46 = vpop.xlane.xlu2 %1645  ;;  %v1693_v19 = vpop.xlane.xlu0 %1692 }
 0x38c   : > { %v1648_v4 = vpop.xlane.xlu1 %1647  ;;  %v1701_v28 = vmul.f32 %v3615_v25, %v1693_v19  ;;  %v1655_v2 = vmul.f32 %v3608_v9, %v1646_v46  ;;  %v2606_v19 = vld [vmem:[#allocation15 + $0x128] sm:$0xf] }
 0x38d   : > { %v1656_v17 = vmul.f32 %v3608_v9, %v1648_v4 }
 0x38e   : > { %v1663_v45 = vadd.f32 %v1655_v2, %v1618_v32 }
 0x393   : > { %v1691_v50 = vpop.xlane.xlu2 %1690 }
 0x394   : > { %v1700_v41 = vmul.f32 %v3615_v25, %v1691_v50 }
 0x396   : > { %v1708_v9 = vadd.f32 %v1700_v41, %v1663_v45 }
 0x39b   : > { %v1603_v39 = vpop.xlane.xlu2 %1602 }
 0x39c   : > { %v1611_v60 = vmul.f32 %v3606_v0, %v1603_v39 }
 0x39e   : > { %v1619_v10 = vadd.f32 %v1611_v60, %v1566_v6 }
 0x3a0   : > { %v1664_v23 = vadd.f32 %v1656_v17, %v1619_v10 }
 0x3a2   : > { %v1709_v34 = vadd.f32 %v1701_v28, %v1664_v23  ;;  %v3765_v28 = vpop.f32.mrf.mxu1 }
 0x3a3   : > { %v3715_v62 = vpop.permute.xlu2 %1750 }
 0x3a4   : > { %v3718_v15 = vpop.permute.xlu1 %1736  ;;  %vm1771_vm4 = vcmp.gt.f32.partialorder %v3715_v62, 0.0 }
 0x3a5   : > { %vm1769_vm3 = vcmp.gt.f32.partialorder %v3718_v15, 0.0  ;;  %v3727_v33 = vsel %vm1771_vm4, %v1707_v59, -1e+30  ;;  %v2653_v59 = vld [vmem:[#allocation15 + $0x138] sm:$0xf0] }
 0x3a6   : > { %v3722_v21 = vsel %vm1769_vm3, %v1705_v12, -1e+30  ;;  %v1828_v36 = vrot.slane %v3727_v33, 4  ;;  %v2607_v27 = vor.u32 %v2653_v59, %v2606_v19 }
 0x3a7   : > { %v1816_v26 = vrot.slane %v3722_v21, 4 }
 0x3a8   : > { %v1829_v54 = vmax.f32 %v3727_v33, %v1828_v36  ;;  %2150 = vmatpush.bf16.msra.mxu2 %v2607_v27 }
 0x3a9   : > { %v1817_v49 = vmax.f32 %v3722_v21, %v1816_v26 }
 0x3aa   : > { %v1830_v46 = vrot.slane %v1829_v54, 2 }
 0x3ab   : > { %v3731_v22 = vpop.permute.xlu2 %1764  ;;  %v1818_v11 = vrot.slane %v1817_v49, 2 }
 0x3ac   : > { %v3737_v42 = vpop.permute.xlu1 %1743  ;;  %vm1773_vm5 = vcmp.gt.f32.partialorder %v3731_v22, 0.0  ;;  %v1831_v61 = vmax.f32 %v1829_v54, %v1830_v46 }
 0x3ad   : > { %vm1770_vm6 = vcmp.gt.f32.partialorder %v3737_v42, 0.0  ;;  %v3742_v44 = vsel %vm1773_vm5, %v1709_v34, -1e+30  ;;  %v1819_v4 = vmax.f32 %v1817_v49, %v1818_v11 }
 0x3ae   : > { %v3745_v52 = vsel %vm1770_vm6, %v1706_v37, -1e+30  ;;  %v1840_v39 = vrot.slane %v3742_v44, 4  ;;  %v1832_v14 = vrot.slane %v1831_v61, 1 }
 0x3af   : > { %v1822_v13 = vrot.slane %v3745_v52, 4  ;;  %v1820_v57 = vrot.slane %v1819_v4, 1 }
 0x3b0   : > { %v1841_v55 = vmax.f32 %v3742_v44, %v1840_v39  ;;  %v1833_v20 = vmax.f32 %v1831_v61, %v1832_v14  ;;  %v2598_v39 = vld [vmem:[#allocation15 + $0xd8] sm:$0xf] }
 0x3b1   : > { %v1823_v0 = vmax.f32 %v3745_v52, %v1822_v13  ;;  %v1821_v48 = vmax.f32 %v1819_v4, %v1820_v57  ;;  %v2651_v13 = vld [vmem:[#allocation15 + $0xe8] sm:$0xf0] }
 0x3b2   : > { %v1842_v25 = vrot.slane %v1841_v55, 2 }
 0x3b3   : > { %v1824_v56 = vrot.slane %v1823_v0, 2  ;;  %v1860_v17 = vsel %vm1859_vm8, %v1821_v48, %v3695_v38  ;;  %v2652_v38 = vld [vmem:[#allocation15 + $0x110] sm:$0xf0]  ;;  %v2650_v48 = vld [vmem:[#allocation15 + $0xc0] sm:$0xf0] }
 0x3b4   : > { %v3753_v58 = vpop.permute.xlu1 %1757  ;;  %v1843_v63 = vmax.f32 %v1841_v55, %v1842_v25  ;;  %v2603_v43 = vor.u32 %v2652_v38, %v2602_v40  ;;  %v1470_v25 = vpop.f32.mrf.mxu1  ;;  %v2582_v38 = vld [vmem:[#allocation15 + $0x38] sm:$0xf] }
 0x3b5   : > { %v1825_v60 = vmax.f32 %v1823_v0, %v1824_v56  ;;  %vm1772_vm7 = vcmp.gt.f32.partialorder %v3753_v58, 0.0  ;;  %v2599_v56 = vor.u32 %v2651_v13, %v2598_v39 }
 0x3b6   : > { %v3758_v50 = vsel %vm1772_vm7, %v1708_v9, -1e+30  ;;  %v1844_v53 = vrot.slane %v1843_v63, 1  ;;  %2151 = vmatpush.bf16.msra.mxu2 %v2603_v43 }
 0x3b7   : > { %v1826_v6 = vrot.slane %v1825_v60, 1  ;;  %v1834_v5 = vrot.slane %v3758_v50, 4 }
 0x3b8   : > { %v1845_v34 = vmax.f32 %v1843_v63, %v1844_v53 }
 0x3b9   : > { %v1835_v8 = vmax.f32 %v3758_v50, %v1834_v5  ;;  %v1827_v10 = vmax.f32 %v1825_v60, %v1826_v6 }
 0x3ba   : > { %2152 = vmatpush.bf16.msra.mxu2 %v2599_v56 }
 0x3bb   : > { %v1836_v12 = vrot.slane %v1835_v8, 2  ;;  %v1862_v23 = vsel %vm1861_vm9, %v1827_v10, %v1860_v17  ;;  %v2649_v17 = vld [vmem:[#allocation15 + $0x98] sm:$0xf0] }
 0x3bc   : > { %v1864_v37 = vsel %vm1863_vm10, %v1833_v20, %v1862_v23  ;;  %v2792_v20 = vld [vmem:[#allocation17 + $0x5] ss:$0 sm:$0xff] }
 0x3bd   : > { %v1837_v16 = vmax.f32 %v1835_v8, %v1836_v12  ;;  %v2594_v8 = vld [vmem:[#allocation15 + $0xb0] sm:$0xf]  ;;  %v1487_v40 = vadd.f32 %v2792_v20, %v3697_v47  ;;  %v1488_v39 = vadd.f32 %v2792_v20, %v3699_v51  ;;  %v3791_v13 = vadd.f32 %v2792_v20, %v3708_v7 }
 0x3be   : > { %v2595_v23 = vor.u32 %v2650_v48, %v2594_v8  ;;  %v3802_v7 = vadd.f32 %v2792_v20, %v3765_v28  ;;  %v1493_v56 = vadd.f32 %v2792_v20, %v1470_v25 }
 0x3bf   : > { %v1838_v26 = vrot.slane %v1837_v16, 1 }
 0x3c0   : > { %2153 = vmatpush.bf16.msra.mxu2 %v2595_v23 }
 0x3c1   : > { %v1839_v49 = vmax.f32 %v1837_v16, %v1838_v26  ;;  %v2590_v16 = vld [vmem:[#allocation15 + $0x88] sm:$0xf] }
 0x3c3   : > { %v1866_v36 = vsel %vm1865_vm11, %v1839_v49, %v1864_v37  ;;  %v2586_v49 = vld [vmem:[#allocation15 + $0x60] sm:$0xf] }
 0x3c4   : > { %v1868_v2 = vsel %vm1867_vm12, %v1845_v34, %v1866_v36  ;;  %v2647_v36 = vld [vmem:[#allocation15 + $0x48] sm:$0xf0] }
 0x3c5   : > { %v3770_v11 = vmax.f32 %v1868_v2, -1e+30 }
 0x3c7   : > { %v1875_v32 = vrot.slane %v3770_v11, 1  ;;  %v1876_v41 = vrot.slane %v3770_v11, 2  ;;  %v1877_v54 = vrot.slane %v3770_v11, 3  ;;  %v1878_v0 = vrot.slane %v3770_v11, 4 }
 0x3c8   : > { %v1879_v45 = vrot.slane %v3770_v11, 5  ;;  %v1880_v4 = vrot.slane %v3770_v11, 6  ;;  %v1882_v55 = vperm.slane %v3770_v11, 0 }
 0x3c9   : > { %v1883_v9 = vperm.slane %v1875_v32, 0  ;;  %v1884_v46 = vperm.slane %v1876_v41, 0  ;;  %v1885_v60 = vperm.slane %v1877_v54, 0  ;;  %v1886_v57 = vperm.slane %v1878_v0, 0  ;;  %v1472_v32 = vpop.f32.mrf.mxu1 }
 0x3ca   : > { %v1887_v6 = vperm.slane %v1879_v45, 0  ;;  %v1888_v5 = vperm.slane %v1880_v4, 0  ;;  %v1898_v61 = vsub.f32 %v3671_v18, %v1882_v55  ;;  %v3797_v0 = vadd.f32 %v2792_v20, %v3756_v3  ;;  %v2578_v45 = vld [vmem:[#allocation15 + $0x10] sm:$0xf]  ;;  %v2646_v4 = vld [vmem:[#allocation15 + $0x20] sm:$0xf0] }
 0x3cb   : > { %v1899_v63 = vsub.f32 %v3680_v1, %v1883_v9  ;;  %v1900_v10 = vsub.f32 %v3689_v24, %v1884_v46  ;;  %v1901_v12 = vsub.f32 %v3722_v21, %v1885_v60  ;;  %v1902_v14 = vsub.f32 %v3745_v52, %v1886_v57  ;;  %v2648_v52 = vld [vmem:[#allocation15 + $0x70] sm:$0xf0] }
 0x3cc   : > { %v1903_v53 = vsub.f32 %v3727_v33, %v1887_v6  ;;  %v1904_v19 = vsub.f32 %v3758_v50, %v1888_v5  ;;  %v1906_v59 = vmul.f32 1.442695, %v1898_v61  ;;  %v2591_v24 = vor.u32 %v2649_v17, %v2590_v16 }
 0x3cd   : > { %v1908_v18 = vmul.f32 1.442695, %v1899_v63  ;;  %v1910_v26 = vmul.f32 1.442695, %v1900_v10  ;;  %v1912_v27 = vmul.f32 1.442695, %v1901_v12  ;;  %v2587_v37 = vor.u32 %v2648_v52, %v2586_v49 }
 0x3ce   : > { %2844 = vpow2.f32 %v1906_v59  ;;  %v1914_v1 = vmul.f32 1.442695, %v1902_v14  ;;  %v1916_v21 = vmul.f32 1.442695, %v1903_v53  ;;  %v1918_v34 = vmul.f32 1.442695, %v1904_v19  ;;  %2154 = vmatpush.bf16.msra.mxu2 %v2591_v24 }
 0x3cf   : > { %2846 = vpow2.f32 %v1908_v18  ;;  %v1871_v33 = vsub.f32 -1e+30, %v3770_v11  ;;  %v1881_v50 = vrot.slane %v3770_v11, 7  ;;  %v3794_v11 = vadd.f32 %v2792_v20, %v3733_v35 }
 0x3d0   : > { %2848 = vpow2.f32 %v1910_v26  ;;  %v2583_v46 = vor.u32 %v2647_v36, %v2582_v38  ;;  %v3805_v60 = vadd.f32 %v2792_v20, %v1472_v32  ;;  %v2579_v61 = vor.u32 %v2646_v4, %v2578_v45 }
 0x3d1   : > { %2850 = vpow2.f32 %v1912_v27  ;;  %v1889_v43 = vperm.slane %v1881_v50, 0  ;;  %v1872_v41 = vmul.f32 1.442695, %v1871_v33 }
 0x3d2   : > { %2852 = vpow2.f32 %v1914_v1  ;;  %2155 = vmatpush.bf16.msra.mxu2 %v2587_v37 }
 0x3d3   : > { %2854 = vpow2.f32 %v1916_v21  ;;  %v1905_v55 = vsub.f32 %v3742_v44, %v1889_v43 }
 0x3d4   : > { %v2845_v2 = vpop.eup %2844  ;;  %2856 = vpow2.f32 %v1918_v34 }
 0x3d5   : > { %v2847_v54 = vpop.eup %2846  ;;  %v1922_v47 = vmul.f32 %v2845_v2, %v3662_v30  ;;  %v1920_v30 = vmul.f32 1.442695, %v1905_v55  ;;  %2858 = vpow2.f32 %v1872_v41 }
 0x3d6   : > { %v2849_v51 = vpop.eup %2848  ;;  %v1923_v9 = vmul.f32 %v2847_v54, %v3664_v31  ;;  %2156 = vmatpush.bf16.msra.mxu2 %v2583_v46 }
 0x3d7   : > { %v2851_v35 = vpop.eup %2850  ;;  %v1924_v3 = vmul.f32 %v2849_v51, %v3660_v29  ;;  %v1932_v57 = vrot.slane %v1922_v47, 4  ;;  %v3814_v48 = vmul.f32 %v1922_v47, %v1487_v40  ;;  %2860 = vpow2.f32 %v1920_v30 }
 0x3d8   : > { %v2853_v6 = vpop.eup %2852  ;;  %v3809_v5 = vmul.f32 %v2851_v35, %v3718_v15  ;;  %v1938_v44 = vrot.slane %v1923_v9, 4  ;;  %v2001_v59 = vmul.f32 %v1923_v9, %v1488_v39 }
 0x3d9   : > { %v2855_v28 = vpop.eup %2854  ;;  %v3812_v25 = vmul.f32 %v2853_v6, %v3737_v42  ;;  %v1933_v31 = vadd.f32 %v1932_v57, %v1922_v47  ;;  %v1944_v8 = vrot.slane %v1924_v3, 4  ;;  %v2002_v35 = vmul.f32 %v1924_v3, %v3791_v13 }
 0x3da   : > { %v2857_v63 = vpop.eup %2856  ;;  %v1927_v29 = vmul.f32 %v2855_v28, %v3715_v62  ;;  %v1939_v10 = vadd.f32 %v1938_v44, %v1923_v9  ;;  %v1950_v12 = vrot.slane %v3809_v5, 4  ;;  %2157 = vmatpush.bf16.msra.mxu2 %v2579_v61 }
 0x3db   : > { %v1928_v15 = vmul.f32 %v2857_v63, %v3753_v58  ;;  %v1934_v14 = vrot.slane %v1933_v31, 2  ;;  %v1945_v16 = vadd.f32 %v1944_v8, %v1924_v3  ;;  %v1956_v17 = vrot.slane %v3812_v25, 4  ;;  %v2859_v27 = vpop.eup %2858 }
 0x3dc   : > { %v1940_v42 = vrot.slane %v1939_v10, 2  ;;  %v1951_v53 = vadd.f32 %v1950_v12, %v3809_v5  ;;  %v1962_v19 = vrot.slane %v1927_v29, 4  ;;  %v2003_v8 = vmul.f32 %v3809_v5, %v3794_v11 }
 0x3dd   : > { %v1935_v23 = vadd.f32 %v1934_v14, %v1933_v31  ;;  %v1946_v18 = vrot.slane %v1945_v16, 2  ;;  %v1957_v62 = vadd.f32 %v1956_v17, %v3812_v25  ;;  %v1968_v26 = vrot.slane %v1928_v15, 4  ;;  %v2861_v33 = vpop.eup %2860 }
 0x3de   : > { %v1941_v20 = vadd.f32 %v1940_v42, %v1939_v10  ;;  %v1952_v1 = vrot.slane %v1951_v53, 2  ;;  %v1963_v24 = vadd.f32 %v1962_v19, %v1927_v29  ;;  %v2006_v21 = vmul.f32 %v1928_v15, %v1493_v56 }
 0x3df   : > { %v1936_v58 = vrot.slane %v1935_v23, 1  ;;  %v1947_v49 = vadd.f32 %v1946_v18, %v1945_v16  ;;  %v1958_v52 = vrot.slane %v1957_v62, 2  ;;  %v1969_v34 = vadd.f32 %v1968_v26, %v1928_v15 }
 0x3e0   : > { %v1942_v50 = vrot.slane %v1941_v20, 1  ;;  %v1953_v37 = vadd.f32 %v1952_v1, %v1951_v53  ;;  %v1964_v40 = vrot.slane %v1963_v24, 2  ;;  %v2044_v38 = vrot.slane %v2006_v21, 4 }
 0x3e1   : > { %v1937_v36 = vadd.f32 %v1936_v58, %v1935_v23  ;;  %v1948_v43 = vrot.slane %v1947_v49, 1  ;;  %v1959_v2 = vadd.f32 %v1958_v52, %v1957_v62  ;;  %v1970_v39 = vrot.slane %v1969_v34, 2 }
 0x3e2   : > { %v1943_v32 = vadd.f32 %v1942_v50, %v1941_v20  ;;  %v1954_v41 = vrot.slane %v1953_v37, 1  ;;  %v1965_v54 = vadd.f32 %v1964_v40, %v1963_v24  ;;  %v2045_v47 = vadd.f32 %v2044_v38, %v2006_v21 }
 0x3e3   : > { %v1949_v45 = vadd.f32 %v1948_v43, %v1947_v49  ;;  %v1960_v4 = vrot.slane %v1959_v2, 1  ;;  %v1971_v55 = vadd.f32 %v1970_v39, %v1969_v34  ;;  %v1929_v51 = vmul.f32 %v2861_v33, %v3731_v22 }
 0x3e4   : > { %v1955_v56 = vadd.f32 %v1954_v41, %v1953_v37  ;;  %v1966_v9 = vrot.slane %v1965_v54, 1  ;;  %v1988_v46 = vsel %vm1855_vm0, %v1943_v32, %v1937_v36  ;;  %v2046_v31 = vrot.slane %v2045_v47, 2 }
 0x3e5   : > { %v1961_v57 = vadd.f32 %v1960_v4, %v1959_v2  ;;  %v1972_v30 = vrot.slane %v1971_v55, 1  ;;  %v1989_v6 = vsel %vm1857_vm2, %v1949_v45, %v1988_v46  ;;  %v1974_v44 = vrot.slane %v1929_v51, 4 }
 0x3e6   : > { %v1967_v61 = vadd.f32 %v1966_v9, %v1965_v54  ;;  %v1990_v28 = vsel %vm1859_vm8, %v1955_v56, %v1989_v6  ;;  %v2004_v12 = vmul.f32 %v3812_v25, %v3797_v0  ;;  %v3833_v3 = vmul.f32 0.0, %v2859_v27 }
 0x3e7   : > { %v1973_v63 = vadd.f32 %v1972_v30, %v1971_v55  ;;  %v1991_v22 = vsel %vm1861_vm9, %v1961_v57, %v1990_v28  ;;  %v1975_v10 = vadd.f32 %v1974_v44, %v1929_v51  ;;  %v2005_v15 = vmul.f32 %v1927_v29, %v3802_v7 }
 0x3e8   : > { %v1992_v13 = vsel %vm1863_vm10, %v1967_v61, %v1991_v22  ;;  %v2007_v14 = vmul.f32 %v1929_v51, %v3805_v60  ;;  %v2008_v11 = vrot.slane %v3814_v48, 4  ;;  %v2014_v5 = vrot.slane %v2001_v59, 4 }
 0x3e9   : > { %v1993_v16 = vsel %vm1865_vm11, %v1973_v63, %v1992_v13  ;;  %v1976_v17 = vrot.slane %v1975_v10, 2  ;;  %v2047_v42 = vadd.f32 %v2046_v31, %v2045_v47  ;;  %v2020_v53 = vrot.slane %v2002_v35, 4 }
 0x3ea   : > { %v2026_v19 = vrot.slane %v2003_v8, 4  ;;  %v2032_v23 = vrot.slane %v2004_v12, 4  ;;  %v2009_v0 = vadd.f32 %v2008_v11, %v3814_v48  ;;  %v2015_v25 = vadd.f32 %v2014_v5, %v2001_v59 }
 0x3eb   : > { %v1977_v18 = vadd.f32 %v1976_v17, %v1975_v10  ;;  %v2038_v62 = vrot.slane %v2005_v15, 4  ;;  %v2021_v26 = vadd.f32 %v2020_v53, %v2002_v35  ;;  %v2050_v29 = vrot.slane %v2007_v14, 4  ;;  %v2793_v17 = vld [vmem:[#allocation17 + $0x6] ss:$0 sm:$0xff] }
 0x3ec   : > { %v2027_v27 = vadd.f32 %v2026_v19, %v2003_v8  ;;  %v2033_v7 = vadd.f32 %v2032_v23, %v2004_v12  ;;  %v2010_v20 = vrot.slane %v2009_v0, 2  ;;  %v2016_v1 = vrot.slane %v2015_v25, 2 }
 0x3ed   : > { %v1978_v60 = vrot.slane %v1977_v18, 1  ;;  %v2039_v24 = vadd.f32 %v2038_v62, %v2005_v15  ;;  %v2022_v21 = vrot.slane %v2021_v26, 2  ;;  %v2051_v52 = vadd.f32 %v2050_v29, %v2007_v14 }
 0x3ee   : > { %v2028_v58 = vrot.slane %v2027_v27, 2  ;;  %v2034_v49 = vrot.slane %v2033_v7, 2  ;;  %v2011_v33 = vadd.f32 %v2010_v20, %v2009_v0  ;;  %v2017_v50 = vadd.f32 %v2016_v1, %v2015_v25 }
 0x3ef   : > { %v1979_v34 = vadd.f32 %v1978_v60, %v1977_v18  ;;  %v2040_v37 = vrot.slane %v2039_v24, 2  ;;  %v2023_v40 = vadd.f32 %v2022_v21, %v2021_v26  ;;  %v2052_v38 = vrot.slane %v2051_v52, 2 }
 0x3f0   : > { %v2029_v48 = vadd.f32 %v2028_v58, %v2027_v27  ;;  %v2035_v59 = vadd.f32 %v2034_v49, %v2033_v7  ;;  %v2012_v43 = vrot.slane %v2011_v33, 1  ;;  %v2018_v2 = vrot.slane %v2017_v50, 1  ;;  %v2794_v49 = vld [vmem:[#allocation17 + $0x7] ss:$0 sm:$0xff] }
 0x3f1   : > { %v1994_v36 = vsel %vm1867_vm12, %v1979_v34, %v1993_v16  ;;  %v2041_v39 = vadd.f32 %v2040_v37, %v2039_v24  ;;  %v2024_v41 = vrot.slane %v2023_v40, 1  ;;  %v2053_v51 = vadd.f32 %v2052_v38, %v2051_v52 }
 0x3f2   : > { %v1996_v32 = vadd.f32 %v1994_v36, %v3833_v3  ;;  %v2030_v54 = vrot.slane %v2029_v48, 1  ;;  %v2036_v47 = vrot.slane %v2035_v59, 1  ;;  %v2013_v45 = vadd.f32 %v2012_v43, %v2011_v33  ;;  %v2795_v33 = vld [vmem:[#allocation17 + $0x8] ss:$0 sm:$0xff] }
 0x3f3   : > { %v2019_v4 = vadd.f32 %v2018_v2, %v2017_v50  ;;  %v2042_v55 = vrot.slane %v2041_v39, 1  ;;  %v2048_v56 = vrot.slane %v2047_v42, 1  ;;  %v2025_v9 = vadd.f32 %v2024_v41, %v2023_v40 }
 0x3f4   : > { %v2079_v46 = vadd.f32 1e-09, %v1996_v32  ;;  %v2031_v35 = vadd.f32 %v2030_v54, %v2029_v48  ;;  %v2054_v57 = vrot.slane %v2053_v51, 1  ;;  %v2037_v6 = vadd.f32 %v2036_v47, %v2035_v59 }
 0x3f5   : > { %v2064_v30 = vsel %vm1855_vm0, %v2019_v4, %v2013_v45  ;;  %v2043_v61 = vadd.f32 %v2042_v55, %v2041_v39  ;;  %v2049_v31 = vadd.f32 %v2048_v56, %v2047_v42  ;;  %v2867_v42 = vld [vmem:[%s431_s15] sm:$0xff]  ;;  %s3098_s15 = scalar_lea.hbm %s3899_s8, 16 }
 0x3f6   : > { %v2065_v44 = vsel %vm1857_vm2, %v2025_v9, %v2064_v30  ;;  %2862 = vrcp.f32 %v2079_v46  ;;  %v2055_v63 = vadd.f32 %v2054_v57, %v2053_v51  ;;  %p3100_p10 = scmp.lt.s32.totalorder %s3098_s15, %s3094_s22 }
 0x3f7   : > { %v2066_v28 = vsel %vm1859_vm8, %v2031_v35, %v2065_v44 }
 0x3f8   : > { %v2067_v8 = vsel %vm1861_vm9, %v2037_v6, %v2066_v28  ;;  %p3101_p11 = por %p3100_p10, %p3099_p8 }
 0x3f9   : > { %v2068_v22 = vsel %vm1863_vm10, %v2043_v61, %v2067_v8 }
 0x3fa   : > { %v2069_v10 = vsel %vm1865_vm11, %v2049_v31, %v2068_v22  ;;  %p3102_p12 = pnand %p3101_p11, %p3097_p4 }
 0x3fb   : > { %v2070_v12 = vsel %vm1867_vm12, %v2055_v63, %v2069_v10 }
 0x3fc   : > { %v2863_v13 = vpop.eup %2862  ;;  %v2072_v15 = vadd.f32 %v2070_v12, %v3833_v3 }
 0x3fe   : > { %v2082_v14 = vmul.f32 %v2863_v13, %v2072_v15 }
 0x400   : > { %v2083_v16 = vpack.c.bf16 %v2082_v14, %v2082_v14 }
 0x402   : > { %2158 = vmatmul.bf16.vlgmr.msra.gmra.mxu2 %v2083_v16 }
 0x485   : > { %v2159_v11 = vpop.f32.mrf.mxu2 }
 0x486   : > { %v2160_v5 = vadd.f32 %v2793_v17, %v2159_v11 }
 0x488   : > { %v2163_v53 = vadd.f32 %v2867_v42, %v2160_v5 }
 0x48a   : > { %2164 = vadd.xlane.f32.xlu1 %v2163_v53  ;;  %v2167_v19 = vmul.f32 %v2163_v53, %v2163_v53 }
 0x48c   : > { %2168 = vadd.xlane.f32.xlu2 %v2167_v19 }
 0x48d   : > { %v2161_v23 = vpop.f32.mrf.mxu2 }
 0x4fd   : > { %v2165_v18 = vpop.xlane.xlu1 %2164 }
 0x4fe   : > { %v2166_v0 = vmul.f32 0.03125, %v2165_v18 }
 0x4ff   : > { %v2169_v25 = vpop.xlane.xlu2 %2168 }
 0x500   : > { %v2171_v62 = vmul.f32 %v2166_v0, %v2166_v0  ;;  %v2170_v26 = vmul.f32 0.03125, %v2169_v25  ;;  %v2174_v58 = vsub.f32 %v2163_v53, %v2166_v0 }
 0x502   : > { %v2172_v3 = vsub.f32 %v2170_v26, %v2171_v62 }
 0x504   : > { %v2173_v27 = vmax.f32 %v2172_v3, 0.0 }
 0x506   : > { %v2175_v7 = vadd.f32 1e-05, %v2173_v27 }
 0x508   : > { %2864 = vrsqrt.f32 %v2175_v7  ;;  %vm2182_vm14 = vweird.f32 %v2175_v7 }
 0x50e   : > { %v2865_v29 = vpop.eup %2864 }
 0x50f   : > { %v2177_v60 = vmul.f32 %v2865_v29, %v2175_v7  ;;  %vm2183_vm13 = vweird.f32 %v2865_v29 }
 0x510   : > { %vm2184_vm15 = vmor %vm2182_vm14, %vm2183_vm13 }
 0x511   : > { %v2178_v20 = vmul.f32 %v2865_v29, %v2177_v60 }
 0x513   : > { %v2179_v1 = vmul.f32 0.5, %v2178_v20 }
 0x515   : > { %v2180_v24 = vsub.f32 1.5, %v2179_v1 }
 0x517   : > { %v2181_v21 = vmul.f32 %v2865_v29, %v2180_v24 }
 0x519   : > { %v2185_v52 = vsel %vm2184_vm15, %v2865_v29, %v2181_v21 }
 0x51a   : > { %v2186_v34 = vmul.f32 %v2185_v52, %v2174_v58 }
 0x51c   : > { %v2189_v50 = vmul.f32 %v2794_v49, %v2186_v34 }
 0x51e   : > { %v2192_v37 = vadd.f32 %v2795_v33, %v2189_v50 }
 0x520   : > { %2193 = vst [vmem:[%s524_s20] sm:$0xff] %v2192_v37 }
 0x521   : > { %3105 = shalt.err (!%p3102_p12)
}
 0x522   : > { %2683 = dma.vmem_to_hbm [thread:$0]  (%p3324_p7), %s2209_s9, 128, %s2211_s19, %s2195_s30  }
 0x523 PF: > { %s2222_s18 = sand.u32 1, %s3156_s27   ;;  %p3934_p13 = scmp.ge.s32.totalorder %s3176_s10, 2 }
 0x524   : > { %s2223_s16 = scalar_lea.sflag [#allocation8], %s2222_s18 }
 0x525   : > { %p2709_p0 = pnand %p3934_p13, %p3283_p6 }
 0x527   : > { %p2710_p3 = pneg %p2709_p0 }
 0x529   : > { %3151 = dma.done.wait (%p2710_p3), %s2223_s16, 128  }
 0x52a   : > { %3153 = vsyncadd (%p2710_p3), %s2223_s16, 4294967168  ;;  %s31_s10 = sadd.s32 1, %s3176_s10   ;;  %s3935_s5 = sld [smem:[#allocation25_spill]] }
 0x52b   : > { %p28_p5 = scmp.ge.s32.totalorder %s31_s10, 4   ;;  %s3936_s29 = sld [smem:[#allocation29_spill]] }
 0x52c   : > { %s3937_s30 = sld [smem:[#allocation26_spill]]  ;;  %s3939_s27 = smov %s3160_s28 }
 0x52d   : > { %s3938_s9 = sld [smem:[#allocation28_spill]]  ;;  %30 = sbr.rel (!%p28_p5) target bundleno = 17 (0x11), region = 154 }
 0x530   : > { %s3940_s28 = smov %s3935_s5 }
 0x532   :  { %2229 = vsyncpa [#allocation7], 1 }
 0x533   :  { %2231 = vsyncpa [#allocation7 + $0x1], 1 }
 0x534   :  { %2232 = vsyncpa [#allocation10], 1 }
 0x535   :  { %2234 = vsyncpa [#allocation10 + $0x1], 1 }
 0x536   :  { %2235 = vsyncpa [#allocation13], 1 }
 0x537   :  { %2237 = vsyncpa [#allocation13 + $0x1], 1 }
 0x538   :  { %2238 = vsyncpa [#allocation16], 1 }
 0x539   :  { %2239 = vsyncpa [#allocation8], 1 }
 0x53a   :  { %2241 = vsyncpa [#allocation8 + $0x1], 1 }

</bundles_post_ra>
